<compile_context>
chip_gen: v7x
topology: tpu7x:2x2x1
jax: 0.10.0
libtpu: 0.0.40
codegen_flags: <defaults>
</compile_context>

<pallas_src>
import functools

import jax
import jax.numpy as jnp
from jax import lax
from jax.experimental import pallas as pl
from jax.experimental.pallas import tpu as pltpu


# bf16 operands + f32 accumulation for the 7x7 conv matmuls (MXU native).
MATMUL_DTYPE = jnp.bfloat16


# ----------------------------- Pallas kernels --------------------------------

def _conv_bn_relu_kernel(p_ref, w_ref, aff_ref, o_ref):
    # p: (TM, K) bf16 patches, w: (K, Cout) bf16, aff: (3, Cout) f32 packed
    # [bias, scale, shift].  Accumulate in f32, epilogue in f32 (v5e-safe).
    acc = jnp.dot(p_ref[...], w_ref[...], preferred_element_type=jnp.float32)
    acc = jnp.maximum(acc + aff_ref[0:1, :], 0.0)          # bias + ReLU
    o_ref[...] = acc * aff_ref[1:2, :] + aff_ref[2:3, :]   # folded eval-mode BN


def _conv_bn_relu_pwadd_kernel(p_ref, w_ref, aff_ref, pb_ref, pw_ref, o_ref):
    # Same as above, plus the fused branch-B 1x1 conv (no bias) and the
    # ParallelSum addition.  The 1x1 contraction K is tiny (4 or 32) and the
    # op is memory-bound, so it stays in f32.
    acc = jnp.dot(p_ref[...], w_ref[...], preferred_element_type=jnp.float32)
    acc = jnp.maximum(acc + aff_ref[0:1, :], 0.0)
    acc = acc * aff_ref[1:2, :] + aff_ref[2:3, :]
    o_ref[...] = acc + jnp.dot(pb_ref[...], pw_ref[...],
                               preferred_element_type=jnp.float32)


def _maxpool_chain_kernel(xph_ref, o_ref, *, S, k, Ho, Wo):
    # xph: (S*S, N, Ho+1, Wo+1, C) stride-S phase split of the (-inf padded)
    # input.  Composite MaxPool(k=2S-1, stride=S, pad=S-1) == `depth` chained
    # MaxPool2d(3,2,1); every tap is a contiguous static slice (no strided
    # access, no 9x stacked windows).
    acc = None
    for ki in range(k):
        for kj in range(k):
            ph = (ki % S) * S + (kj % S)
            tap = xph_ref[ph, :, ki // S:ki // S + Ho, kj // S:kj // S + Wo, :]
            acc = tap if acc is None else jnp.maximum(acc, tap)
    o_ref[...] = acc


# --------------------------- plain-JAX glue -----------------------------------

def _im2col_concat(x, k, stride, pad):
    # (N,H,W,C) -> (N,Ho,Wo,k*k*C): concatenate the k*k strided taps along the
    # channel axis (tap-major, channel-minor K).  No 5-D stack+transpose.
    N, H, W, C = x.shape
    xp = jnp.pad(x, ((0, 0), (pad, pad), (pad, pad), (0, 0)))
    Ho = (H + 2 * pad - k) // stride + 1
    Wo = (W + 2 * pad - k) // stride + 1
    taps = []
    for i in range(k):
        for j in range(k):
            taps.append(xp[:, i:i + stride * (Ho - 1) + 1:stride,
                           j:j + stride * (Wo - 1) + 1:stride, :])
    return jnp.concatenate(taps, axis=-1), Ho, Wo


def _pick_tile_m(M):
    # Tile the flattened spatial dim when it is large (pipelined DMA overlap;
    # >=2 "parallel" steps feed both v7x TensorCores).  Tiny demo shapes
    # collapse to one full-array block (exempt from the (8,128) constraint).
    for t in (512, 256, 128):
        if M > t and M % t == 0:
            return t
    return M


# ------------------------------ fused ops --------------------------------------

def conv7x7_relu_bn(x, layer, pooled=None, pw_w=None, *, stride=2, pad=3, eps=1e-5):
    """Conv2d(k,s,p)+bias -> ReLU -> BN(eval) [-> + Conv1x1(pooled) ParallelSum]."""
    N, H, W, Cin = x.shape
    w = layer['w']
    Cout, _, KH, KW = w.shape
    cols, Ho, Wo = _im2col_concat(x, KH, stride, pad)
    M, K = N * Ho * Wo, KH * KW * Cin

    p = cols.reshape(M, K).astype(MATMUL_DTYPE)
    wm = jnp.transpose(w, (2, 3, 1, 0)).reshape(K, Cout).astype(MATMUL_DTYPE)
    scale = layer['gamma'] * lax.rsqrt(layer['var'] + eps)
    shift = layer['beta'] - layer['mean'] * scale
    aff = jnp.stack([layer['b'], scale, shift]).astype(jnp.float32)   # (3, Cout)

    tm = _pick_tile_m(M)
    grid = (M // tm,)
    in_specs = [pl.BlockSpec((tm, K), lambda i: (i, 0)),
                pl.BlockSpec((K, Cout), lambda i: (0, 0)),
                pl.BlockSpec((3, Cout), lambda i: (0, 0))]
    args = [p, wm, aff]

    if pooled is None:
        kernel = _conv_bn_relu_kernel
    else:
        kernel = _conv_bn_relu_pwadd_kernel
        Cb = pooled.shape[-1]
        pb = pooled.reshape(M, Cb)   # pool-chain spatial == conv-chain spatial
        pwm = jnp.transpose(pw_w.reshape(Cout, Cb), (1, 0)).astype(jnp.float32)
        in_specs += [pl.BlockSpec((tm, Cb), lambda i: (i, 0)),
                     pl.BlockSpec((Cb, Cout), lambda i: (0, 0))]
        args += [pb, pwm]

    out = pl.pallas_call(
        kernel,
        out_shape=jax.ShapeDtypeStruct((M, Cout), jnp.float32),
        grid=grid,
        in_specs=in_specs,
        out_specs=pl.BlockSpec((tm, Cout), lambda i: (i, 0)),
        compiler_params=pltpu.CompilerParams(
            dimension_semantics=("parallel",),
            vmem_limit_bytes=32 * 1024 * 1024),   # fits v5e/v6e/v7x scoped VMEM
    )(*args)
    return out.reshape(N, Ho, Wo, Cout)


def maxpool_chain(x, depth):
    """`depth` chained MaxPool2d(3,2,1) fused into one composite pool kernel.

    Chaining MaxPool(3,2,1) d times is exactly MaxPool(2^(d+1)-1, 2^d, 2^d-1):
    the extra composite-window positions are all padding (-inf, neutral for
    max), so results are identical for any H.
    """
    N, H, W, C = x.shape
    S = 2 ** depth
    pad = S - 1
    k = 2 * S - 1
    Ho = (H - 1) // S + 1
    Wo = (W - 1) // S + 1
    Hp, Wp = S * (Ho + 1), S * (Wo + 1)
    xp = jnp.pad(x.astype(jnp.float32),
                 ((0, 0), (pad, Hp - pad - H), (pad, Wp - pad - W), (0, 0)),
                 constant_values=-jnp.inf)
    # Stride-S phase split: same byte count as the padded input (no blow-up);
    # all in-kernel taps become contiguous static slices.
    xph = xp.reshape(N, Ho + 1, S, Wo + 1, S, C)
    xph = jnp.transpose(xph, (2, 4, 0, 1, 3, 5)).reshape(S * S, N, Ho + 1, Wo + 1, C)
    return pl.pallas_call(
        functools.partial(_maxpool_chain_kernel, S=S, k=k, Ho=Ho, Wo=Wo),
        out_shape=jax.ShapeDtypeStruct((N, Ho, Wo, C), jnp.float32),
        in_specs=[pl.BlockSpec(memory_space=pltpu.MemorySpace.VMEM)],
        out_specs=pl.BlockSpec(memory_space=pltpu.MemorySpace.VMEM),
        compiler_params=pltpu.CompilerParams(vmem_limit_bytes=32 * 1024 * 1024),
    )(xph)


# --------------------------- parameters / forward -----------------------------

def init_params(key, num_input_channels, num_hidden_channels,
                kernel_size, num_blocks, block_depth):
    params = []
    for bi in range(num_blocks):
        keys = jax.random.split(key, 16)
        key = keys[0]
        branch_a = []
        for li in range(block_depth):
            cin = num_input_channels if (bi == 0 and li == 0) else num_hidden_channels
            kk = jax.random.split(keys[1 + li], 6)
            fan_in = cin * kernel_size * kernel_size
            w = jax.random.normal(
                kk[0], (num_hidden_channels, cin, kernel_size, kernel_size),
                jnp.float32) * (2.0 / fan_in) ** 0.5
            b = 0.05 * jax.random.normal(kk[1], (num_hidden_channels,), jnp.float32)
            gamma = 1.0 + 0.1 * jax.random.normal(kk[2], (num_hidden_channels,), jnp.float32)
            beta = 0.1 * jax.random.normal(kk[3], (num_hidden_channels,), jnp.float32)
            mean = 0.1 * jax.random.normal(kk[4], (num_hidden_channels,), jnp.float32)
            var = 0.5 + jax.random.uniform(kk[5], (num_hidden_channels,), jnp.float32)
            branch_a.append(dict(w=w, b=b, gamma=gamma, beta=beta, mean=mean, var=var))
        cin_b = num_input_channels if bi == 0 else num_hidden_channels
        pw_w = jax.random.normal(keys[10], (num_hidden_channels, cin_b, 1, 1),
                                 jnp.float32) * (1.0 / cin_b) ** 0.5
        params.append(dict(branch_a=branch_a, pw_w=pw_w))
    return params


def panel_encoder_forward(x_nchw, params, block_depth=2):
    # NCHW in/out (PyTorch convention); NHWC internally.
    x = jnp.transpose(x_nchw, (0, 2, 3, 1)).astype(jnp.float32)
    for blk in params:
        # Branch B pools (both stages fused into one kernel).
        pooled = maxpool_chain(x, block_depth)
        # Branch A convs; the last one fuses branch B's 1x1 conv + ParallelSum.
        a = x
        layers = blk['branch_a']
        for li, layer in enumerate(layers):
            last = li == len(layers) - 1
            a = conv7x7_relu_bn(a, layer,
                                pooled=pooled if last else None,
                                pw_w=blk['pw_w'] if last else None)
        x = a   # Dropout2d(p=0.0) == identity
    return jnp.transpose(x, (0, 3, 1, 2))


# --------------------------- pure-JAX reference --------------------------------

def _ref_forward(x_nchw, params, block_depth=2, eps=1e-5):
    # Pure-XLA reference.  Branch-A conv operands are rounded through
    # MATMUL_DTYPE exactly like the Pallas kernels (bf16 inputs, f32
    # accumulation), so the comparison isolates kernel correctness.  Branch B
    # uses two genuinely chained reduce_windows, which also validates the
    # composite-pool fusion.
    x = jnp.transpose(x_nchw, (0, 2, 3, 1)).astype(jnp.float32)

    def conv(x, w, b, stride, pad, cast):
        if cast:
            x = x.astype(MATMUL_DTYPE).astype(jnp.float32)
            w = w.astype(MATMUL_DTYPE).astype(jnp.float32)
        y = lax.conv_general_dilated(
            x, jnp.transpose(w, (2, 3, 1, 0)), (stride, stride),
            ((pad, pad), (pad, pad)),
            dimension_numbers=('NHWC', 'HWIO', 'NHWC'))
        return y if b is None else y + b

    def maxpool(x):
        return lax.reduce_window(x, -jnp.inf, lax.max, (1, 3, 3, 1),
                                 (1, 2, 2, 1), ((0, 0), (1, 1), (1, 1), (0, 0)))

    for blk in params:
        a = x
        for layer in blk['branch_a']:
            a = conv(a, layer['w'], layer['b'], 2, 3, cast=True)
            a = jnp.maximum(a, 0.0)
            a = (a - layer['mean']) / jnp.sqrt(layer['var'] + eps) * layer['gamma'] + layer['beta']
        b = x
        for _ in range(block_depth):
            b = maxpool(b)
        b = conv(b, blk['pw_w'], None, 1, 0, cast=False)
        x = a + b
    return jnp.transpose(x, (0, 3, 1, 2))


# ------------------------------------ main -------------------------------------

if __name__ == "__main__":
    key = jax.random.PRNGKey(0)
    kx, kp = jax.random.split(key)

    # image_size=16 keeps the module's output_image_ratio == 2 configuration
    # (same MaxPool(3,2,1) setup as the default image_size=80) at demo scale.
    N, Cin, H = 2, 4, 16
    Chid, ksz, nblk, depth = 32, 7, 2, 2

    x = jax.random.normal(kx, (N, Cin, H, H), jnp.float32)
    params = init_params(kp, Cin, Chid, ksz, nblk, depth)

    out = jax.block_until_ready(panel_encoder_forward(x, params, block_depth=depth))
    ref = jax.block_until_ready(_ref_forward(x, params, block_depth=depth))

    out_size = H // (2 ** (nblk * depth))   # PanelEncoder.output_image_size == 1
    assert out.shape == (N, Chid, out_size, out_size), out.shape
    # Both paths use bf16 conv operands with f32 accumulation; the tolerance
    # covers re-rounding divergence of intermediate activations between the
    # Pallas and XLA implementations across the 4 stacked conv layers.
    assert jnp.allclose(out, ref, rtol=1e-2, atol=1e-2), \
        float(jnp.max(jnp.abs(out - ref)))

    print("KERNEL_OK")
</pallas_src>

<mosaic_0001>
module attributes {stable_mosaic.version = 11 : i64} {
  func.func @_maxpool_chain_kernel(%arg0: memref<16x2x5x5x4xf32, #tpu.memory_space<vmem>>, %arg1: memref<2x4x4x4xf32, #tpu.memory_space<vmem>>) attributes {dimension_semantics = [], scalar_prefetch = 0 : i64, scratch_operands = 0 : i64, tpu.core_type = #tpu.core_type<tc>} {
    %c0 = arith.constant 0 : index
    %c0_0 = arith.constant 0 : index
    %c0_1 = arith.constant 0 : index
    %c0_2 = arith.constant 0 : index
    %c0_3 = arith.constant 0 : index
    %0 = vector.load %arg0[%c0, %c0_0, %c0_1, %c0_2, %c0_3] : memref<16x2x5x5x4xf32, #tpu.memory_space<vmem>>, vector<1x2x4x4x4xf32>
    %1 = vector.shape_cast %0 : vector<1x2x4x4x4xf32> to vector<2x4x4x4xf32>
    %c1 = arith.constant 1 : index
    %c0_4 = arith.constant 0 : index
    %c0_5 = arith.constant 0 : index
    %c0_6 = arith.constant 0 : index
    %c0_7 = arith.constant 0 : index
    %2 = vector.load %arg0[%c1, %c0_4, %c0_5, %c0_6, %c0_7] : memref<16x2x5x5x4xf32, #tpu.memory_space<vmem>>, vector<1x2x4x4x4xf32>
    %3 = vector.shape_cast %2 : vector<1x2x4x4x4xf32> to vector<2x4x4x4xf32>
    %4 = arith.maximumf %1, %3 : vector<2x4x4x4xf32>
    %c2 = arith.constant 2 : index
    %c0_8 = arith.constant 0 : index
    %c0_9 = arith.constant 0 : index
    %c0_10 = arith.constant 0 : index
    %c0_11 = arith.constant 0 : index
    %5 = vector.load %arg0[%c2, %c0_8, %c0_9, %c0_10, %c0_11] : memref<16x2x5x5x4xf32, #tpu.memory_space<vmem>>, vector<1x2x4x4x4xf32>
    %6 = vector.shape_cast %5 : vector<1x2x4x4x4xf32> to vector<2x4x4x4xf32>
    %7 = arith.maximumf %4, %6 : vector<2x4x4x4xf32>
    %c3 = arith.constant 3 : index
    %c0_12 = arith.constant 0 : index
    %c0_13 = arith.constant 0 : index
    %c0_14 = arith.constant 0 : index
    %c0_15 = arith.constant 0 : index
    %8 = vector.load %arg0[%c3, %c0_12, %c0_13, %c0_14, %c0_15] : memref<16x2x5x5x4xf32, #tpu.memory_space<vmem>>, vector<1x2x4x4x4xf32>
    %9 = vector.shape_cast %8 : vector<1x2x4x4x4xf32> to vector<2x4x4x4xf32>
    %10 = arith.maximumf %7, %9 : vector<2x4x4x4xf32>
    %c0_16 = arith.constant 0 : index
    %c0_17 = arith.constant 0 : index
    %c0_18 = arith.constant 0 : index
    %c1_19 = arith.constant 1 : index
    %c0_20 = arith.constant 0 : index
    %11 = vector.load %arg0[%c0_16, %c0_17, %c0_18, %c1_19, %c0_20] : memref<16x2x5x5x4xf32, #tpu.memory_space<vmem>>, vector<1x2x4x4x4xf32>
    %12 = vector.shape_cast %11 : vector<1x2x4x4x4xf32> to vector<2x4x4x4xf32>
    %13 = arith.maximumf %10, %12 : vector<2x4x4x4xf32>
    %c1_21 = arith.constant 1 : index
    %c0_22 = arith.constant 0 : index
    %c0_23 = arith.constant 0 : index
    %c1_24 = arith.constant 1 : index
    %c0_25 = arith.constant 0 : index
    %14 = vector.load %arg0[%c1_21, %c0_22, %c0_23, %c1_24, %c0_25] : memref<16x2x5x5x4xf32, #tpu.memory_space<vmem>>, vector<1x2x4x4x4xf32>
    %15 = vector.shape_cast %14 : vector<1x2x4x4x4xf32> to vector<2x4x4x4xf32>
    %16 = arith.maximumf %13, %15 : vector<2x4x4x4xf32>
    %c2_26 = arith.constant 2 : index
    %c0_27 = arith.constant 0 : index
    %c0_28 = arith.constant 0 : index
    %c1_29 = arith.constant 1 : index
    %c0_30 = arith.constant 0 : index
    %17 = vector.load %arg0[%c2_26, %c0_27, %c0_28, %c1_29, %c0_30] : memref<16x2x5x5x4xf32, #tpu.memory_space<vmem>>, vector<1x2x4x4x4xf32>
    %18 = vector.shape_cast %17 : vector<1x2x4x4x4xf32> to vector<2x4x4x4xf32>
    %19 = arith.maximumf %16, %18 : vector<2x4x4x4xf32>
    %c4 = arith.constant 4 : index
    %c0_31 = arith.constant 0 : index
    %c0_32 = arith.constant 0 : index
    %c0_33 = arith.constant 0 : index
    %c0_34 = arith.constant 0 : index
    %20 = vector.load %arg0[%c4, %c0_31, %c0_32, %c0_33, %c0_34] : memref<16x2x5x5x4xf32, #tpu.memory_space<vmem>>, vector<1x2x4x4x4xf32>
    %21 = vector.shape_cast %20 : vector<1x2x4x4x4xf32> to vector<2x4x4x4xf32>
    %22 = arith.maximumf %19, %21 : vector<2x4x4x4xf32>
    %c5 = arith.constant 5 : index
    %c0_35 = arith.constant 0 : index
    %c0_36 = arith.constant 0 : index
    %c0_37 = arith.constant 0 : index
    %c0_38 = arith.constant 0 : index
    %23 = vector.load %arg0[%c5, %c0_35, %c0_36, %c0_37, %c0_38] : memref<16x2x5x5x4xf32, #tpu.memory_space<vmem>>, vector<1x2x4x4x4xf32>
    %24 = vector.shape_cast %23 : vector<1x2x4x4x4xf32> to vector<2x4x4x4xf32>
    %25 = arith.maximumf %22, %24 : vector<2x4x4x4xf32>
    %c6 = arith.constant 6 : index
    %c0_39 = arith.constant 0 : index
    %c0_40 = arith.constant 0 : index
    %c0_41 = arith.constant 0 : index
    %c0_42 = arith.constant 0 : index
    %26 = vector.load %arg0[%c6, %c0_39, %c0_40, %c0_41, %c0_42] : memref<16x2x5x5x4xf32, #tpu.memory_space<vmem>>, vector<1x2x4x4x4xf32>
    %27 = vector.shape_cast %26 : vector<1x2x4x4x4xf32> to vector<2x4x4x4xf32>
    %28 = arith.maximumf %25, %27 : vector<2x4x4x4xf32>
    %c7 = arith.constant 7 : index
    %c0_43 = arith.constant 0 : index
    %c0_44 = arith.constant 0 : index
    %c0_45 = arith.constant 0 : index
    %c0_46 = arith.constant 0 : index
    %29 = vector.load %arg0[%c7, %c0_43, %c0_44, %c0_45, %c0_46] : memref<16x2x5x5x4xf32, #tpu.memory_space<vmem>>, vector<1x2x4x4x4xf32>
    %30 = vector.shape_cast %29 : vector<1x2x4x4x4xf32> to vector<2x4x4x4xf32>
    %31 = arith.maximumf %28, %30 : vector<2x4x4x4xf32>
    %c4_47 = arith.constant 4 : index
    %c0_48 = arith.constant 0 : index
    %c0_49 = arith.constant 0 : index
    %c1_50 = arith.constant 1 : index
    %c0_51 = arith.constant 0 : index
    %32 = vector.load %arg0[%c4_47, %c0_48, %c0_49, %c1_50, %c0_51] : memref<16x2x5x5x4xf32, #tpu.memory_space<vmem>>, vector<1x2x4x4x4xf32>
    %33 = vector.shape_cast %32 : vector<1x2x4x4x4xf32> to vector<2x4x4x4xf32>
    %34 = arith.maximumf %31, %33 : vector<2x4x4x4xf32>
    %c5_52 = arith.constant 5 : index
    %c0_53 = arith.constant 0 : index
    %c0_54 = arith.constant 0 : index
    %c1_55 = arith.constant 1 : index
    %c0_56 = arith.constant 0 : index
    %35 = vector.load %arg0[%c5_52, %c0_53, %c0_54, %c1_55, %c0_56] : memref<16x2x5x5x4xf32, #tpu.memory_space<vmem>>, vector<1x2x4x4x4xf32>
    %36 = vector.shape_cast %35 : vector<1x2x4x4x4xf32> to vector<2x4x4x4xf32>
    %37 = arith.maximumf %34, %36 : vector<2x4x4x4xf32>
    %c6_57 = arith.constant 6 : index
    %c0_58 = arith.constant 0 : index
    %c0_59 = arith.constant 0 : index
    %c1_60 = arith.constant 1 : index
    %c0_61 = arith.constant 0 : index
    %38 = vector.load %arg0[%c6_57, %c0_58, %c0_59, %c1_60, %c0_61] : memref<16x2x5x5x4xf32, #tpu.memory_space<vmem>>, vector<1x2x4x4x4xf32>
    %39 = vector.shape_cast %38 : vector<1x2x4x4x4xf32> to vector<2x4x4x4xf32>
    %40 = arith.maximumf %37, %39 : vector<2x4x4x4xf32>
    %c8 = arith.constant 8 : index
    %c0_62 = arith.constant 0 : index
    %c0_63 = arith.constant 0 : index
    %c0_64 = arith.constant 0 : index
    %c0_65 = arith.constant 0 : index
    %41 = vector.load %arg0[%c8, %c0_62, %c0_63, %c0_64, %c0_65] : memref<16x2x5x5x4xf32, #tpu.memory_space<vmem>>, vector<1x2x4x4x4xf32>
    %42 = vector.shape_cast %41 : vector<1x2x4x4x4xf32> to vector<2x4x4x4xf32>
    %43 = arith.maximumf %40, %42 : vector<2x4x4x4xf32>
    %c9 = arith.constant 9 : index
    %c0_66 = arith.constant 0 : index
    %c0_67 = arith.constant 0 : index
    %c0_68 = arith.constant 0 : index
    %c0_69 = arith.constant 0 : index
    %44 = vector.load %arg0[%c9, %c0_66, %c0_67, %c0_68, %c0_69] : memref<16x2x5x5x4xf32, #tpu.memory_space<vmem>>, vector<1x2x4x4x4xf32>
    %45 = vector.shape_cast %44 : vector<1x2x4x4x4xf32> to vector<2x4x4x4xf32>
    %46 = arith.maximumf %43, %45 : vector<2x4x4x4xf32>
    %c10 = arith.constant 10 : index
    %c0_70 = arith.constant 0 : index
    %c0_71 = arith.constant 0 : index
    %c0_72 = arith.constant 0 : index
    %c0_73 = arith.constant 0 : index
    %47 = vector.load %arg0[%c10, %c0_70, %c0_71, %c0_72, %c0_73] : memref<16x2x5x5x4xf32, #tpu.memory_space<vmem>>, vector<1x2x4x4x4xf32>
    %48 = vector.shape_cast %47 : vector<1x2x4x4x4xf32> to vector<2x4x4x4xf32>
    %49 = arith.maximumf %46, %48 : vector<2x4x4x4xf32>
    %c11 = arith.constant 11 : index
    %c0_74 = arith.constant 0 : index
    %c0_75 = arith.constant 0 : index
    %c0_76 = arith.constant 0 : index
    %c0_77 = arith.constant 0 : index
    %50 = vector.load %arg0[%c11, %c0_74, %c0_75, %c0_76, %c0_77] : memref<16x2x5x5x4xf32, #tpu.memory_space<vmem>>, vector<1x2x4x4x4xf32>
    %51 = vector.shape_cast %50 : vector<1x2x4x4x4xf32> to vector<2x4x4x4xf32>
    %52 = arith.maximumf %49, %51 : vector<2x4x4x4xf32>
    %c8_78 = arith.constant 8 : index
    %c0_79 = arith.constant 0 : index
    %c0_80 = arith.constant 0 : index
    %c1_81 = arith.constant 1 : index
    %c0_82 = arith.constant 0 : index
    %53 = vector.load %arg0[%c8_78, %c0_79, %c0_80, %c1_81, %c0_82] : memref<16x2x5x5x4xf32, #tpu.memory_space<vmem>>, vector<1x2x4x4x4xf32>
    %54 = vector.shape_cast %53 : vector<1x2x4x4x4xf32> to vector<2x4x4x4xf32>
    %55 = arith.maximumf %52, %54 : vector<2x4x4x4xf32>
    %c9_83 = arith.constant 9 : index
    %c0_84 = arith.constant 0 : index
    %c0_85 = arith.constant 0 : index
    %c1_86 = arith.constant 1 : index
    %c0_87 = arith.constant 0 : index
    %56 = vector.load %arg0[%c9_83, %c0_84, %c0_85, %c1_86, %c0_87] : memref<16x2x5x5x4xf32, #tpu.memory_space<vmem>>, vector<1x2x4x4x4xf32>
    %57 = vector.shape_cast %56 : vector<1x2x4x4x4xf32> to vector<2x4x4x4xf32>
    %58 = arith.maximumf %55, %57 : vector<2x4x4x4xf32>
    %c10_88 = arith.constant 10 : index
    %c0_89 = arith.constant 0 : index
    %c0_90 = arith.constant 0 : index
    %c1_91 = arith.constant 1 : index
    %c0_92 = arith.constant 0 : index
    %59 = vector.load %arg0[%c10_88, %c0_89, %c0_90, %c1_91, %c0_92] : memref<16x2x5x5x4xf32, #tpu.memory_space<vmem>>, vector<1x2x4x4x4xf32>
    %60 = vector.shape_cast %59 : vector<1x2x4x4x4xf32> to vector<2x4x4x4xf32>
    %61 = arith.maximumf %58, %60 : vector<2x4x4x4xf32>
    %c12 = arith.constant 12 : index
    %c0_93 = arith.constant 0 : index
    %c0_94 = arith.constant 0 : index
    %c0_95 = arith.constant 0 : index
    %c0_96 = arith.constant 0 : index
    %62 = vector.load %arg0[%c12, %c0_93, %c0_94, %c0_95, %c0_96] : memref<16x2x5x5x4xf32, #tpu.memory_space<vmem>>, vector<1x2x4x4x4xf32>
    %63 = vector.shape_cast %62 : vector<1x2x4x4x4xf32> to vector<2x4x4x4xf32>
    %64 = arith.maximumf %61, %63 : vector<2x4x4x4xf32>
    %c13 = arith.constant 13 : index
    %c0_97 = arith.constant 0 : index
    %c0_98 = arith.constant 0 : index
    %c0_99 = arith.constant 0 : index
    %c0_100 = arith.constant 0 : index
    %65 = vector.load %arg0[%c13, %c0_97, %c0_98, %c0_99, %c0_100] : memref<16x2x5x5x4xf32, #tpu.memory_space<vmem>>, vector<1x2x4x4x4xf32>
    %66 = vector.shape_cast %65 : vector<1x2x4x4x4xf32> to vector<2x4x4x4xf32>
    %67 = arith.maximumf %64, %66 : vector<2x4x4x4xf32>
    %c14 = arith.constant 14 : index
    %c0_101 = arith.constant 0 : index
    %c0_102 = arith.constant 0 : index
    %c0_103 = arith.constant 0 : index
    %c0_104 = arith.constant 0 : index
    %68 = vector.load %arg0[%c14, %c0_101, %c0_102, %c0_103, %c0_104] : memref<16x2x5x5x4xf32, #tpu.memory_space<vmem>>, vector<1x2x4x4x4xf32>
    %69 = vector.shape_cast %68 : vector<1x2x4x4x4xf32> to vector<2x4x4x4xf32>
    %70 = arith.maximumf %67, %69 : vector<2x4x4x4xf32>
    %c15 = arith.constant 15 : index
    %c0_105 = arith.constant 0 : index
    %c0_106 = arith.constant 0 : index
    %c0_107 = arith.constant 0 : index
    %c0_108 = arith.constant 0 : index
    %71 = vector.load %arg0[%c15, %c0_105, %c0_106, %c0_107, %c0_108] : memref<16x2x5x5x4xf32, #tpu.memory_space<vmem>>, vector<1x2x4x4x4xf32>
    %72 = vector.shape_cast %71 : vector<1x2x4x4x4xf32> to vector<2x4x4x4xf32>
    %73 = arith.maximumf %70, %72 : vector<2x4x4x4xf32>
    %c12_109 = arith.constant 12 : index
    %c0_110 = arith.constant 0 : index
    %c0_111 = arith.constant 0 : index
    %c1_112 = arith.constant 1 : index
    %c0_113 = arith.constant 0 : index
    %74 = vector.load %arg0[%c12_109, %c0_110, %c0_111, %c1_112, %c0_113] : memref<16x2x5x5x4xf32, #tpu.memory_space<vmem>>, vector<1x2x4x4x4xf32>
    %75 = vector.shape_cast %74 : vector<1x2x4x4x4xf32> to vector<2x4x4x4xf32>
    %76 = arith.maximumf %73, %75 : vector<2x4x4x4xf32>
    %c13_114 = arith.constant 13 : index
    %c0_115 = arith.constant 0 : index
    %c0_116 = arith.constant 0 : index
    %c1_117 = arith.constant 1 : index
    %c0_118 = arith.constant 0 : index
    %77 = vector.load %arg0[%c13_114, %c0_115, %c0_116, %c1_117, %c0_118] : memref<16x2x5x5x4xf32, #tpu.memory_space<vmem>>, vector<1x2x4x4x4xf32>
    %78 = vector.shape_cast %77 : vector<1x2x4x4x4xf32> to vector<2x4x4x4xf32>
    %79 = arith.maximumf %76, %78 : vector<2x4x4x4xf32>
    %c14_119 = arith.constant 14 : index
    %c0_120 = arith.constant 0 : index
    %c0_121 = arith.constant 0 : index
    %c1_122 = arith.constant 1 : index
    %c0_123 = arith.constant 0 : index
    %80 = vector.load %arg0[%c14_119, %c0_120, %c0_121, %c1_122, %c0_123] : memref<16x2x5x5x4xf32, #tpu.memory_space<vmem>>, vector<1x2x4x4x4xf32>
    %81 = vector.shape_cast %80 : vector<1x2x4x4x4xf32> to vector<2x4x4x4xf32>
    %82 = arith.maximumf %79, %81 : vector<2x4x4x4xf32>
    %c0_124 = arith.constant 0 : index
    %c0_125 = arith.constant 0 : index
    %c1_126 = arith.constant 1 : index
    %c0_127 = arith.constant 0 : index
    %c0_128 = arith.constant 0 : index
    %83 = vector.load %arg0[%c0_124, %c0_125, %c1_126, %c0_127, %c0_128] : memref<16x2x5x5x4xf32, #tpu.memory_space<vmem>>, vector<1x2x4x4x4xf32>
    %84 = vector.shape_cast %83 : vector<1x2x4x4x4xf32> to vector<2x4x4x4xf32>
    %85 = arith.maximumf %82, %84 : vector<2x4x4x4xf32>
    %c1_129 = arith.constant 1 : index
    %c0_130 = arith.constant 0 : index
    %c1_131 = arith.constant 1 : index
    %c0_132 = arith.constant 0 : index
    %c0_133 = arith.constant 0 : index
    %86 = vector.load %arg0[%c1_129, %c0_130, %c1_131, %c0_132, %c0_133] : memref<16x2x5x5x4xf32, #tpu.memory_space<vmem>>, vector<1x2x4x4x4xf32>
    %87 = vector.shape_cast %86 : vector<1x2x4x4x4xf32> to vector<2x4x4x4xf32>
    %88 = arith.maximumf %85, %87 : vector<2x4x4x4xf32>
    %c2_134 = arith.constant 2 : index
    %c0_135 = arith.constant 0 : index
    %c1_136 = arith.constant 1 : index
    %c0_137 = arith.constant 0 : index
    %c0_138 = arith.constant 0 : index
    %89 = vector.load %arg0[%c2_134, %c0_135, %c1_136, %c0_137, %c0_138] : memref<16x2x5x5x4xf32, #tpu.memory_space<vmem>>, vector<1x2x4x4x4xf32>
    %90 = vector.shape_cast %89 : vector<1x2x4x4x4xf32> to vector<2x4x4x4xf32>
    %91 = arith.maximumf %88, %90 : vector<2x4x4x4xf32>
    %c3_139 = arith.constant 3 : index
    %c0_140 = arith.constant 0 : index
    %c1_141 = arith.constant 1 : index
    %c0_142 = arith.constant 0 : index
    %c0_143 = arith.constant 0 : index
    %92 = vector.load %arg0[%c3_139, %c0_140, %c1_141, %c0_142, %c0_143] : memref<16x2x5x5x4xf32, #tpu.memory_space<vmem>>, vector<1x2x4x4x4xf32>
    %93 = vector.shape_cast %92 : vector<1x2x4x4x4xf32> to vector<2x4x4x4xf32>
    %94 = arith.maximumf %91, %93 : vector<2x4x4x4xf32>
    %c0_144 = arith.constant 0 : index
    %c0_145 = arith.constant 0 : index
    %c1_146 = arith.constant 1 : index
    %c1_147 = arith.constant 1 : index
    %c0_148 = arith.constant 0 : index
    %95 = vector.load %arg0[%c0_144, %c0_145, %c1_146, %c1_147, %c0_148] : memref<16x2x5x5x4xf32, #tpu.memory_space<vmem>>, vector<1x2x4x4x4xf32>
    %96 = vector.shape_cast %95 : vector<1x2x4x4x4xf32> to vector<2x4x4x4xf32>
    %97 = arith.maximumf %94, %96 : vector<2x4x4x4xf32>
    %c1_149 = arith.constant 1 : index
    %c0_150 = arith.constant 0 : index
    %c1_151 = arith.constant 1 : index
    %c1_152 = arith.constant 1 : index
    %c0_153 = arith.constant 0 : index
    %98 = vector.load %arg0[%c1_149, %c0_150, %c1_151, %c1_152, %c0_153] : memref<16x2x5x5x4xf32, #tpu.memory_space<vmem>>, vector<1x2x4x4x4xf32>
    %99 = vector.shape_cast %98 : vector<1x2x4x4x4xf32> to vector<2x4x4x4xf32>
    %100 = arith.maximumf %97, %99 : vector<2x4x4x4xf32>
    %c2_154 = arith.constant 2 : index
    %c0_155 = arith.constant 0 : index
    %c1_156 = arith.constant 1 : index
    %c1_157 = arith.constant 1 : index
    %c0_158 = arith.constant 0 : index
    %101 = vector.load %arg0[%c2_154, %c0_155, %c1_156, %c1_157, %c0_158] : memref<16x2x5x5x4xf32, #tpu.memory_space<vmem>>, vector<1x2x4x4x4xf32>
    %102 = vector.shape_cast %101 : vector<1x2x4x4x4xf32> to vector<2x4x4x4xf32>
    %103 = arith.maximumf %100, %102 : vector<2x4x4x4xf32>
    %c4_159 = arith.constant 4 : index
    %c0_160 = arith.constant 0 : index
    %c1_161 = arith.constant 1 : index
    %c0_162 = arith.constant 0 : index
    %c0_163 = arith.constant 0 : index
    %104 = vector.load %arg0[%c4_159, %c0_160, %c1_161, %c0_162, %c0_163] : memref<16x2x5x5x4xf32, #tpu.memory_space<vmem>>, vector<1x2x4x4x4xf32>
    %105 = vector.shape_cast %104 : vector<1x2x4x4x4xf32> to vector<2x4x4x4xf32>
    %106 = arith.maximumf %103, %105 : vector<2x4x4x4xf32>
    %c5_164 = arith.constant 5 : index
    %c0_165 = arith.constant 0 : index
    %c1_166 = arith.constant 1 : index
    %c0_167 = arith.constant 0 : index
    %c0_168 = arith.constant 0 : index
    %107 = vector.load %arg0[%c5_164, %c0_165, %c1_166, %c0_167, %c0_168] : memref<16x2x5x5x4xf32, #tpu.memory_space<vmem>>, vector<1x2x4x4x4xf32>
    %108 = vector.shape_cast %107 : vector<1x2x4x4x4xf32> to vector<2x4x4x4xf32>
    %109 = arith.maximumf %106, %108 : vector<2x4x4x4xf32>
    %c6_169 = arith.constant 6 : index
    %c0_170 = arith.constant 0 : index
    %c1_171 = arith.constant 1 : index
    %c0_172 = arith.constant 0 : index
    %c0_173 = arith.constant 0 : index
    %110 = vector.load %arg0[%c6_169, %c0_170, %c1_171, %c0_172, %c0_173] : memref<16x2x5x5x4xf32, #tpu.memory_space<vmem>>, vector<1x2x4x4x4xf32>
    %111 = vector.shape_cast %110 : vector<1x2x4x4x4xf32> to vector<2x4x4x4xf32>
    %112 = arith.maximumf %109, %111 : vector<2x4x4x4xf32>
    %c7_174 = arith.constant 7 : index
    %c0_175 = arith.constant 0 : index
    %c1_176 = arith.constant 1 : index
    %c0_177 = arith.constant 0 : index
    %c0_178 = arith.constant 0 : index
    %113 = vector.load %arg0[%c7_174, %c0_175, %c1_176, %c0_177, %c0_178] : memref<16x2x5x5x4xf32, #tpu.memory_space<vmem>>, vector<1x2x4x4x4xf32>
    %114 = vector.shape_cast %113 : vector<1x2x4x4x4xf32> to vector<2x4x4x4xf32>
    %115 = arith.maximumf %112, %114 : vector<2x4x4x4xf32>
    %c4_179 = arith.constant 4 : index
    %c0_180 = arith.constant 0 : index
    %c1_181 = arith.constant 1 : index
    %c1_182 = arith.constant 1 : index
    %c0_183 = arith.constant 0 : index
    %116 = vector.load %arg0[%c4_179, %c0_180, %c1_181, %c1_182, %c0_183] : memref<16x2x5x5x4xf32, #tpu.memory_space<vmem>>, vector<1x2x4x4x4xf32>
    %117 = vector.shape_cast %116 : vector<1x2x4x4x4xf32> to vector<2x4x4x4xf32>
    %118 = arith.maximumf %115, %117 : vector<2x4x4x4xf32>
    %c5_184 = arith.constant 5 : index
    %c0_185 = arith.constant 0 : index
    %c1_186 = arith.constant 1 : index
    %c1_187 = arith.constant 1 : index
    %c0_188 = arith.constant 0 : index
    %119 = vector.load %arg0[%c5_184, %c0_185, %c1_186, %c1_187, %c0_188] : memref<16x2x5x5x4xf32, #tpu.memory_space<vmem>>, vector<1x2x4x4x4xf32>
    %120 = vector.shape_cast %119 : vector<1x2x4x4x4xf32> to vector<2x4x4x4xf32>
    %121 = arith.maximumf %118, %120 : vector<2x4x4x4xf32>
    %c6_189 = arith.constant 6 : index
    %c0_190 = arith.constant 0 : index
    %c1_191 = arith.constant 1 : index
    %c1_192 = arith.constant 1 : index
    %c0_193 = arith.constant 0 : index
    %122 = vector.load %arg0[%c6_189, %c0_190, %c1_191, %c1_192, %c0_193] : memref<16x2x5x5x4xf32, #tpu.memory_space<vmem>>, vector<1x2x4x4x4xf32>
    %123 = vector.shape_cast %122 : vector<1x2x4x4x4xf32> to vector<2x4x4x4xf32>
    %124 = arith.maximumf %121, %123 : vector<2x4x4x4xf32>
    %c8_194 = arith.constant 8 : index
    %c0_195 = arith.constant 0 : index
    %c1_196 = arith.constant 1 : index
    %c0_197 = arith.constant 0 : index
    %c0_198 = arith.constant 0 : index
    %125 = vector.load %arg0[%c8_194, %c0_195, %c1_196, %c0_197, %c0_198] : memref<16x2x5x5x4xf32, #tpu.memory_space<vmem>>, vector<1x2x4x4x4xf32>
    %126 = vector.shape_cast %125 : vector<1x2x4x4x4xf32> to vector<2x4x4x4xf32>
    %127 = arith.maximumf %124, %126 : vector<2x4x4x4xf32>
    %c9_199 = arith.constant 9 : index
    %c0_200 = arith.constant 0 : index
    %c1_201 = arith.constant 1 : index
    %c0_202 = arith.constant 0 : index
    %c0_203 = arith.constant 0 : index
    %128 = vector.load %arg0[%c9_199, %c0_200, %c1_201, %c0_202, %c0_203] : memref<16x2x5x5x4xf32, #tpu.memory_space<vmem>>, vector<1x2x4x4x4xf32>
    %129 = vector.shape_cast %128 : vector<1x2x4x4x4xf32> to vector<2x4x4x4xf32>
    %130 = arith.maximumf %127, %129 : vector<2x4x4x4xf32>
    %c10_204 = arith.constant 10 : index
    %c0_205 = arith.constant 0 : index
    %c1_206 = arith.constant 1 : index
    %c0_207 = arith.constant 0 : index
    %c0_208 = arith.constant 0 : index
    %131 = vector.load %arg0[%c10_204, %c0_205, %c1_206, %c0_207, %c0_208] : memref<16x2x5x5x4xf32, #tpu.memory_space<vmem>>, vector<1x2x4x4x4xf32>
    %132 = vector.shape_cast %131 : vector<1x2x4x4x4xf32> to vector<2x4x4x4xf32>
    %133 = arith.maximumf %130, %132 : vector<2x4x4x4xf32>
    %c11_209 = arith.constant 11 : index
    %c0_210 = arith.constant 0 : index
    %c1_211 = arith.constant 1 : index
    %c0_212 = arith.constant 0 : index
    %c0_213 = arith.constant 0 : index
    %134 = vector.load %arg0[%c11_209, %c0_210, %c1_211, %c0_212, %c0_213] : memref<16x2x5x5x4xf32, #tpu.memory_space<vmem>>, vector<1x2x4x4x4xf32>
    %135 = vector.shape_cast %134 : vector<1x2x4x4x4xf32> to vector<2x4x4x4xf32>
    %136 = arith.maximumf %133, %135 : vector<2x4x4x4xf32>
    %c8_214 = arith.constant 8 : index
    %c0_215 = arith.constant 0 : index
    %c1_216 = arith.constant 1 : index
    %c1_217 = arith.constant 1 : index
    %c0_218 = arith.constant 0 : index
    %137 = vector.load %arg0[%c8_214, %c0_215, %c1_216, %c1_217, %c0_218] : memref<16x2x5x5x4xf32, #tpu.memory_space<vmem>>, vector<1x2x4x4x4xf32>
    %138 = vector.shape_cast %137 : vector<1x2x4x4x4xf32> to vector<2x4x4x4xf32>
    %139 = arith.maximumf %136, %138 : vector<2x4x4x4xf32>
    %c9_219 = arith.constant 9 : index
    %c0_220 = arith.constant 0 : index
    %c1_221 = arith.constant 1 : index
    %c1_222 = arith.constant 1 : index
    %c0_223 = arith.constant 0 : index
    %140 = vector.load %arg0[%c9_219, %c0_220, %c1_221, %c1_222, %c0_223] : memref<16x2x5x5x4xf32, #tpu.memory_space<vmem>>, vector<1x2x4x4x4xf32>
    %141 = vector.shape_cast %140 : vector<1x2x4x4x4xf32> to vector<2x4x4x4xf32>
    %142 = arith.maximumf %139, %141 : vector<2x4x4x4xf32>
    %c10_224 = arith.constant 10 : index
    %c0_225 = arith.constant 0 : index
    %c1_226 = arith.constant 1 : index
    %c1_227 = arith.constant 1 : index
    %c0_228 = arith.constant 0 : index
    %143 = vector.load %arg0[%c10_224, %c0_225, %c1_226, %c1_227, %c0_228] : memref<16x2x5x5x4xf32, #tpu.memory_space<vmem>>, vector<1x2x4x4x4xf32>
    %144 = vector.shape_cast %143 : vector<1x2x4x4x4xf32> to vector<2x4x4x4xf32>
    %145 = arith.maximumf %142, %144 : vector<2x4x4x4xf32>
    %c0_229 = arith.constant 0 : index
    %c0_230 = arith.constant 0 : index
    %c0_231 = arith.constant 0 : index
    %c0_232 = arith.constant 0 : index
    %146 = vector.load %arg1[%c0_229, %c0_230, %c0_231, %c0_232] : memref<2x4x4x4xf32, #tpu.memory_space<vmem>>, vector<2x4x4x4xf32>
    tpu.vector_store %arg1[%c0_229, %c0_230, %c0_231, %c0_232], %145 {strides = array<i32>} : memref<2x4x4x4xf32, #tpu.memory_space<vmem>>, vector<2x4x4x4xf32>,
    return
  }
}

</mosaic_0001>

<bundles_post_ra>
// kernel: tpu_custom_call.1
= control target key start
LH: loop header
LB: loop body
LE: loop exit
PB: predicated region body
PF: predicated region fallthrough
CT: control target
= control target key end

     0   :  { %6 = vsyncpa [#allocation3], 0  ;;  %vm812_vm0 = vcmask 27648   ;;  %s1240_s7 = smov [#allocation2]   ;;  %s2441_s0 = inlined_call_operand.vmem [shape: f32[16,2,5,5,4], index: 0, kind: input, shape index: {}]   ;;  %s2442_s1 = inlined_call_operand.hbm [shape: f32[2,4,4,4], index: 1, kind: output, shape index: {}]  }
   0x1   :  { %v9_v0 = vld [vmem:[%s2441_s0] sm:$0xf]  ;;  %v10_v1 = vld [vmem:[%s2441_s0 + $0x8] sm:$0xf]  ;;  %v11_v2 = vld [vmem:[%s2441_s0 + $0x10] sm:$0xf] }
   0x2   :  { %v12_v3 = vld [vmem:[%s2441_s0 + $0x18] sm:$0xf]  ;;  %v13_v4 = vld [vmem:[%s2441_s0 + $0x28] sm:$0xf]  ;;  %v14_v5 = vld [vmem:[%s2441_s0 + $0x30] sm:$0xf] }
   0x3   :  { %v15_v6 = vld [vmem:[%s2441_s0 + $0x38] sm:$0xf]  ;;  %v16_v7 = vld [vmem:[%s2441_s0 + $0x40] sm:$0xf]  ;;  %v837_v8 = vld [vmem:[%s2441_s0 + $0x50] sm:$0xf] }
   0x4   :  { %v838_v9 = vld [vmem:[%s2441_s0 + $0x58] sm:$0xf]  ;;  %v839_v10 = vld [vmem:[%s2441_s0 + $0x60] sm:$0xf]  ;;  %v840_v11 = vld [vmem:[%s2441_s0 + $0x68] sm:$0xf]  ;;  %v26_v14 = vmax.f32 %v9_v0, %v837_v8 }
   0x5   :  { %v841_v12 = vld [vmem:[%s2441_s0 + $0x78] sm:$0xf]  ;;  %v842_v13 = vld [vmem:[%s2441_s0 + $0x80] sm:$0xf]  ;;  %v27_v15 = vmax.f32 %v10_v1, %v838_v9  ;;  %v28_v16 = vmax.f32 %v11_v2, %v839_v10  ;;  %v843_v17 = vld [vmem:[%s2441_s0 + $0x88] sm:$0xf]  ;;  %v29_v19 = vmax.f32 %v12_v3, %v840_v11 }
   0x6   :  { %v844_v18 = vld [vmem:[%s2441_s0 + $0x90] sm:$0xf]  ;;  %v30_v20 = vmax.f32 %v13_v4, %v841_v12  ;;  %v31_v21 = vmax.f32 %v14_v5, %v842_v13  ;;  %v845_v22 = vld [vmem:[%s2441_s0 + $0xa0] sm:$0xf]  ;;  %v32_v23 = vmax.f32 %v15_v6, %v843_v17  ;;  %v846_v25 = vld [vmem:[%s2441_s0 + $0xa8] sm:$0xf] }
   0x7   :  { %v33_v24 = vmax.f32 %v16_v7, %v844_v18  ;;  %v847_v26 = vld [vmem:[%s2441_s0 + $0xb0] sm:$0xf]  ;;  %v848_v27 = vld [vmem:[%s2441_s0 + $0xb8] sm:$0xf]  ;;  %v43_v28 = vmax.f32 %v26_v14, %v845_v22  ;;  %v849_v29 = vld [vmem:[%s2441_s0 + $0xc8] sm:$0xf]  ;;  %v44_v32 = vmax.f32 %v27_v15, %v846_v25 }
   0x8   :  { %v850_v30 = vld [vmem:[%s2441_s0 + $0xd0] sm:$0xf]  ;;  %v851_v31 = vld [vmem:[%s2441_s0 + $0xd8] sm:$0xf]  ;;  %v45_v33 = vmax.f32 %v28_v16, %v847_v26  ;;  %v46_v34 = vmax.f32 %v29_v19, %v848_v27  ;;  %v852_v35 = vld [vmem:[%s2441_s0 + $0xe0] sm:$0xf]  ;;  %v47_v36 = vmax.f32 %v30_v20, %v849_v29 }
   0x9   :  { %v48_v37 = vmax.f32 %v31_v21, %v850_v30  ;;  %v49_v38 = vmax.f32 %v32_v23, %v851_v31  ;;  %v853_v39 = vld [vmem:[%s2441_s0 + $0xf0] sm:$0xf]  ;;  %v854_v40 = vld [vmem:[%s2441_s0 + $0xf8] sm:$0xf]  ;;  %v50_v41 = vmax.f32 %v33_v24, %v852_v35  ;;  %v855_v42 = vld [vmem:[%s2441_s0 + $0x100] sm:$0xf] }
   0xa   :  { %v856_v43 = vld [vmem:[%s2441_s0 + $0x108] sm:$0xf]  ;;  %v857_v44 = vld [vmem:[%s2441_s0 + $0x118] sm:$0xf]  ;;  %v60_v45 = vmax.f32 %v43_v28, %v853_v39  ;;  %v61_v46 = vmax.f32 %v44_v32, %v854_v40  ;;  %v858_v47 = vld [vmem:[%s2441_s0 + $0x120] sm:$0xf]  ;;  %v62_v50 = vmax.f32 %v45_v33, %v855_v42 }
   0xb   :  { %v859_v48 = vld [vmem:[%s2441_s0 + $0x128] sm:$0xf]  ;;  %v860_v49 = vld [vmem:[%s2441_s0 + $0x130] sm:$0xf]  ;;  %v63_v51 = vmax.f32 %v46_v34, %v856_v43  ;;  %v64_v52 = vmax.f32 %v47_v36, %v857_v44  ;;  %v65_v53 = vmax.f32 %v48_v37, %v858_v47  ;;  %v68_v56 = vld [vmem:[%s2441_s0 + $0x1] sm:$0xf] }
   0xc   :  { %v66_v54 = vmax.f32 %v49_v38, %v859_v48  ;;  %v67_v55 = vmax.f32 %v50_v41, %v860_v49  ;;  %v69_v57 = vld [vmem:[%s2441_s0 + $0x9] sm:$0xf]  ;;  %v70_v58 = vld [vmem:[%s2441_s0 + $0x11] sm:$0xf]  ;;  %v71_v59 = vld [vmem:[%s2441_s0 + $0x19] sm:$0xf]  ;;  %v76_v62 = vmax.f32 %v60_v45, %v68_v56 }
   0xd   :  { %v72_v60 = vld [vmem:[%s2441_s0 + $0x29] sm:$0xf]  ;;  %v73_v61 = vld [vmem:[%s2441_s0 + $0x31] sm:$0xf]  ;;  %v77_v63 = vmax.f32 %v61_v46, %v69_v57  ;;  %v78_v0 = vmax.f32 %v62_v50, %v70_v58  ;;  %v74_v1 = vld [vmem:[%s2441_s0 + $0x39] sm:$0xf]  ;;  %v79_v3 = vmax.f32 %v63_v51, %v71_v59 }
   0xe   :  { %v75_v2 = vld [vmem:[%s2441_s0 + $0x41] sm:$0xf]  ;;  %v80_v4 = vmax.f32 %v64_v52, %v72_v60  ;;  %v81_v5 = vmax.f32 %v65_v53, %v73_v61  ;;  %v861_v6 = vld [vmem:[%s2441_s0 + $0x51] sm:$0xf]  ;;  %v82_v7 = vmax.f32 %v66_v54, %v74_v1  ;;  %v862_v9 = vld [vmem:[%s2441_s0 + $0x59] sm:$0xf] }
   0xf   :  { %v83_v8 = vmax.f32 %v67_v55, %v75_v2  ;;  %v863_v10 = vld [vmem:[%s2441_s0 + $0x61] sm:$0xf]  ;;  %v864_v11 = vld [vmem:[%s2441_s0 + $0x69] sm:$0xf]  ;;  %v92_v12 = vmax.f32 %v76_v62, %v861_v6  ;;  %v865_v13 = vld [vmem:[%s2441_s0 + $0x79] sm:$0xf]  ;;  %v93_v16 = vmax.f32 %v77_v63, %v862_v9 }
  0x10   :  { %v866_v14 = vld [vmem:[%s2441_s0 + $0x81] sm:$0xf]  ;;  %v867_v15 = vld [vmem:[%s2441_s0 + $0x89] sm:$0xf]  ;;  %v94_v17 = vmax.f32 %v78_v0, %v863_v10  ;;  %v95_v18 = vmax.f32 %v79_v3, %v864_v11  ;;  %v868_v19 = vld [vmem:[%s2441_s0 + $0x91] sm:$0xf]  ;;  %v96_v20 = vmax.f32 %v80_v4, %v865_v13 }
  0x11   :  { %v97_v21 = vmax.f32 %v81_v5, %v866_v14  ;;  %v98_v22 = vmax.f32 %v82_v7, %v867_v15  ;;  %v869_v23 = vld [vmem:[%s2441_s0 + $0xa1] sm:$0xf]  ;;  %v870_v24 = vld [vmem:[%s2441_s0 + $0xa9] sm:$0xf]  ;;  %v99_v25 = vmax.f32 %v83_v8, %v868_v19  ;;  %v871_v26 = vld [vmem:[%s2441_s0 + $0xb1] sm:$0xf] }
  0x12   :  { %v872_v27 = vld [vmem:[%s2441_s0 + $0xb9] sm:$0xf]  ;;  %v873_v28 = vld [vmem:[%s2441_s0 + $0xc9] sm:$0xf]  ;;  %v108_v29 = vmax.f32 %v92_v12, %v869_v23  ;;  %v109_v30 = vmax.f32 %v93_v16, %v870_v24  ;;  %v874_v31 = vld [vmem:[%s2441_s0 + $0xd1] sm:$0xf]  ;;  %v110_v34 = vmax.f32 %v94_v17, %v871_v26 }
  0x13   :  { %v875_v32 = vld [vmem:[%s2441_s0 + $0xd9] sm:$0xf]  ;;  %v876_v33 = vld [vmem:[%s2441_s0 + $0xe1] sm:$0xf]  ;;  %v111_v35 = vmax.f32 %v95_v18, %v872_v27  ;;  %v112_v36 = vmax.f32 %v96_v20, %v873_v28  ;;  %v113_v37 = vmax.f32 %v97_v21, %v874_v31  ;;  %v878_v41 = vld [vmem:[%s2441_s0 + $0x148] sm:$0xf] }
  0x14   :  { %v114_v38 = vmax.f32 %v98_v22, %v875_v32  ;;  %v115_v39 = vmax.f32 %v99_v25, %v876_v33  ;;  %v877_v40 = vld [vmem:[%s2441_s0 + $0x140] sm:$0xf]  ;;  %v879_v42 = vld [vmem:[%s2441_s0 + $0x150] sm:$0xf]  ;;  %v880_v43 = vld [vmem:[%s2441_s0 + $0x158] sm:$0xf]  ;;  %v126_v47 = vmax.f32 %v109_v30, %v878_v41 }
  0x15   :  { %v881_v44 = vld [vmem:[%s2441_s0 + $0x168] sm:$0xf]  ;;  %v882_v45 = vld [vmem:[%s2441_s0 + $0x170] sm:$0xf]  ;;  %v125_v46 = vmax.f32 %v108_v29, %v877_v40  ;;  %v127_v48 = vmax.f32 %v110_v34, %v879_v42  ;;  %v883_v49 = vld [vmem:[%s2441_s0 + $0x178] sm:$0xf]  ;;  %v128_v51 = vmax.f32 %v111_v35, %v880_v43 }
  0x16   :  { %v884_v50 = vld [vmem:[%s2441_s0 + $0x180] sm:$0xf]  ;;  %v129_v52 = vmax.f32 %v112_v36, %v881_v44  ;;  %v130_v53 = vmax.f32 %v113_v37, %v882_v45  ;;  %v885_v54 = vld [vmem:[%s2441_s0 + $0x190] sm:$0xf]  ;;  %v131_v55 = vmax.f32 %v114_v38, %v883_v49  ;;  %v886_v57 = vld [vmem:[%s2441_s0 + $0x198] sm:$0xf] }
  0x17   :  { %v132_v56 = vmax.f32 %v115_v39, %v884_v50  ;;  %v887_v58 = vld [vmem:[%s2441_s0 + $0x1a0] sm:$0xf]  ;;  %v888_v59 = vld [vmem:[%s2441_s0 + $0x1a8] sm:$0xf]  ;;  %v142_v60 = vmax.f32 %v125_v46, %v885_v54  ;;  %v889_v61 = vld [vmem:[%s2441_s0 + $0x1b8] sm:$0xf]  ;;  %v143_v0 = vmax.f32 %v126_v47, %v886_v57 }
  0x18   :  { %v890_v62 = vld [vmem:[%s2441_s0 + $0x1c0] sm:$0xf]  ;;  %v891_v63 = vld [vmem:[%s2441_s0 + $0x1c8] sm:$0xf]  ;;  %v144_v1 = vmax.f32 %v127_v48, %v887_v58  ;;  %v145_v2 = vmax.f32 %v128_v51, %v888_v59  ;;  %v892_v3 = vld [vmem:[%s2441_s0 + $0x1d0] sm:$0xf]  ;;  %v146_v4 = vmax.f32 %v129_v52, %v889_v61 }
  0x19   :  { %v147_v5 = vmax.f32 %v130_v53, %v890_v62  ;;  %v148_v6 = vmax.f32 %v131_v55, %v891_v63  ;;  %v893_v7 = vld [vmem:[%s2441_s0 + $0x1e0] sm:$0xf]  ;;  %v894_v8 = vld [vmem:[%s2441_s0 + $0x1e8] sm:$0xf]  ;;  %v149_v9 = vmax.f32 %v132_v56, %v892_v3  ;;  %v895_v10 = vld [vmem:[%s2441_s0 + $0x1f0] sm:$0xf] }
  0x1a   :  { %v896_v11 = vld [vmem:[%s2441_s0 + $0x1f8] sm:$0xf]  ;;  %v897_v12 = vld [vmem:[%s2441_s0 + $0x208] sm:$0xf]  ;;  %v159_v13 = vmax.f32 %v142_v60, %v893_v7  ;;  %v160_v14 = vmax.f32 %v143_v0, %v894_v8  ;;  %v898_v15 = vld [vmem:[%s2441_s0 + $0x210] sm:$0xf]  ;;  %v161_v18 = vmax.f32 %v144_v1, %v895_v10 }
  0x1b   :  { %v899_v16 = vld [vmem:[%s2441_s0 + $0x218] sm:$0xf]  ;;  %v900_v17 = vld [vmem:[%s2441_s0 + $0x220] sm:$0xf]  ;;  %v162_v19 = vmax.f32 %v145_v2, %v896_v11  ;;  %v163_v20 = vmax.f32 %v146_v4, %v897_v12  ;;  %v164_v21 = vmax.f32 %v147_v5, %v898_v15  ;;  %v901_v24 = vld [vmem:[%s2441_s0 + $0x230] sm:$0xf] }
  0x1c   :  { %v165_v22 = vmax.f32 %v148_v6, %v899_v16  ;;  %v166_v23 = vmax.f32 %v149_v9, %v900_v17  ;;  %v902_v25 = vld [vmem:[%s2441_s0 + $0x238] sm:$0xf]  ;;  %v903_v26 = vld [vmem:[%s2441_s0 + $0x240] sm:$0xf]  ;;  %v904_v27 = vld [vmem:[%s2441_s0 + $0x248] sm:$0xf]  ;;  %v176_v30 = vmax.f32 %v159_v13, %v901_v24 }
  0x1d   :  { %v905_v28 = vld [vmem:[%s2441_s0 + $0x258] sm:$0xf]  ;;  %v906_v29 = vld [vmem:[%s2441_s0 + $0x260] sm:$0xf]  ;;  %v177_v31 = vmax.f32 %v160_v14, %v902_v25  ;;  %v178_v32 = vmax.f32 %v161_v18, %v903_v26  ;;  %v907_v33 = vld [vmem:[%s2441_s0 + $0x268] sm:$0xf]  ;;  %v179_v35 = vmax.f32 %v162_v19, %v904_v27 }
  0x1e   :  { %v908_v34 = vld [vmem:[%s2441_s0 + $0x270] sm:$0xf]  ;;  %v180_v36 = vmax.f32 %v163_v20, %v905_v28  ;;  %v181_v37 = vmax.f32 %v164_v21, %v906_v29  ;;  %v909_v38 = vld [vmem:[%s2441_s0 + $0x141] sm:$0xf]  ;;  %v182_v39 = vmax.f32 %v165_v22, %v907_v33  ;;  %v910_v41 = vld [vmem:[%s2441_s0 + $0x149] sm:$0xf] }
  0x1f   :  { %v183_v40 = vmax.f32 %v166_v23, %v908_v34  ;;  %v911_v42 = vld [vmem:[%s2441_s0 + $0x151] sm:$0xf]  ;;  %v912_v43 = vld [vmem:[%s2441_s0 + $0x159] sm:$0xf]  ;;  %v192_v44 = vmax.f32 %v176_v30, %v909_v38  ;;  %v913_v45 = vld [vmem:[%s2441_s0 + $0x169] sm:$0xf]  ;;  %v193_v48 = vmax.f32 %v177_v31, %v910_v41 }
  0x20   :  { %v914_v46 = vld [vmem:[%s2441_s0 + $0x171] sm:$0xf]  ;;  %v915_v47 = vld [vmem:[%s2441_s0 + $0x179] sm:$0xf]  ;;  %v194_v49 = vmax.f32 %v178_v32, %v911_v42  ;;  %v195_v50 = vmax.f32 %v179_v35, %v912_v43  ;;  %v916_v51 = vld [vmem:[%s2441_s0 + $0x181] sm:$0xf]  ;;  %v196_v52 = vmax.f32 %v180_v36, %v913_v45 }
  0x21   :  { %v197_v53 = vmax.f32 %v181_v37, %v914_v46  ;;  %v198_v54 = vmax.f32 %v182_v39, %v915_v47  ;;  %v917_v55 = vld [vmem:[%s2441_s0 + $0x191] sm:$0xf]  ;;  %v918_v56 = vld [vmem:[%s2441_s0 + $0x199] sm:$0xf]  ;;  %v199_v57 = vmax.f32 %v183_v40, %v916_v51  ;;  %v919_v58 = vld [vmem:[%s2441_s0 + $0x1a1] sm:$0xf] }
  0x22   :  { %v920_v59 = vld [vmem:[%s2441_s0 + $0x1a9] sm:$0xf]  ;;  %v921_v60 = vld [vmem:[%s2441_s0 + $0x1b9] sm:$0xf]  ;;  %v208_v61 = vmax.f32 %v192_v44, %v917_v55  ;;  %v209_v62 = vmax.f32 %v193_v48, %v918_v56  ;;  %v922_v63 = vld [vmem:[%s2441_s0 + $0x1c1] sm:$0xf]  ;;  %v210_v2 = vmax.f32 %v194_v49, %v919_v58 }
  0x23   :  { %v923_v0 = vld [vmem:[%s2441_s0 + $0x1c9] sm:$0xf]  ;;  %v924_v1 = vld [vmem:[%s2441_s0 + $0x1d1] sm:$0xf]  ;;  %v211_v3 = vmax.f32 %v195_v50, %v920_v59  ;;  %v212_v4 = vmax.f32 %v196_v52, %v921_v60  ;;  %v213_v5 = vmax.f32 %v197_v53, %v922_v63  ;;  %v925_v8 = vld [vmem:[%s2441_s0 + $0x1e1] sm:$0xf] }
  0x24   :  { %v214_v6 = vmax.f32 %v198_v54, %v923_v0  ;;  %v215_v7 = vmax.f32 %v199_v57, %v924_v1  ;;  %v926_v9 = vld [vmem:[%s2441_s0 + $0x1e9] sm:$0xf]  ;;  %v927_v10 = vld [vmem:[%s2441_s0 + $0x1f1] sm:$0xf]  ;;  %v928_v11 = vld [vmem:[%s2441_s0 + $0x1f9] sm:$0xf]  ;;  %v224_v14 = vmax.f32 %v208_v61, %v925_v8 }
  0x25   :  { %v929_v12 = vld [vmem:[%s2441_s0 + $0x209] sm:$0xf]  ;;  %v930_v13 = vld [vmem:[%s2441_s0 + $0x211] sm:$0xf]  ;;  %v225_v15 = vmax.f32 %v209_v62, %v926_v9  ;;  %v226_v16 = vmax.f32 %v210_v2, %v927_v10  ;;  %v931_v17 = vld [vmem:[%s2441_s0 + $0x219] sm:$0xf]  ;;  %v227_v19 = vmax.f32 %v211_v3, %v928_v11 }
  0x26   :  { %v932_v18 = vld [vmem:[%s2441_s0 + $0x221] sm:$0xf]  ;;  %v228_v20 = vmax.f32 %v212_v4, %v929_v12  ;;  %v229_v21 = vmax.f32 %v213_v5, %v930_v13  ;;  %v230_v23 = vmax.f32 %v214_v6, %v931_v17  ;;  %v934_v25 = vld [vmem:[%s2441_s0 + $0x288] sm:$0xf]  ;;  %v935_v26 = vld [vmem:[%s2441_s0 + $0x290] sm:$0xf] }
  0x27   :  { %v933_v22 = vld [vmem:[%s2441_s0 + $0x280] sm:$0xf]  ;;  %v231_v24 = vmax.f32 %v215_v7, %v932_v18  ;;  %v936_v27 = vld [vmem:[%s2441_s0 + $0x298] sm:$0xf]  ;;  %v937_v29 = vld [vmem:[%s2441_s0 + $0x2a8] sm:$0xf]  ;;  %v242_v32 = vmax.f32 %v225_v15, %v934_v25  ;;  %v243_v33 = vmax.f32 %v226_v16, %v935_v26 }
  0x28   :  { %v241_v28 = vmax.f32 %v224_v14, %v933_v22  ;;  %v938_v30 = vld [vmem:[%s2441_s0 + $0x2b0] sm:$0xf]  ;;  %v939_v31 = vld [vmem:[%s2441_s0 + $0x2b8] sm:$0xf]  ;;  %v244_v34 = vmax.f32 %v227_v19, %v936_v27  ;;  %v940_v35 = vld [vmem:[%s2441_s0 + $0x2c0] sm:$0xf]  ;;  %v245_v36 = vmax.f32 %v228_v20, %v937_v29 }
  0x29   :  { %v246_v37 = vmax.f32 %v229_v21, %v938_v30  ;;  %v247_v38 = vmax.f32 %v230_v23, %v939_v31  ;;  %v941_v39 = vld [vmem:[%s2441_s0 + $0x2d0] sm:$0xf]  ;;  %v942_v40 = vld [vmem:[%s2441_s0 + $0x2d8] sm:$0xf]  ;;  %v248_v41 = vmax.f32 %v231_v24, %v940_v35  ;;  %v943_v42 = vld [vmem:[%s2441_s0 + $0x2e0] sm:$0xf] }
  0x2a   :  { %v944_v43 = vld [vmem:[%s2441_s0 + $0x2e8] sm:$0xf]  ;;  %v945_v44 = vld [vmem:[%s2441_s0 + $0x2f8] sm:$0xf]  ;;  %v258_v45 = vmax.f32 %v241_v28, %v941_v39  ;;  %v259_v46 = vmax.f32 %v242_v32, %v942_v40  ;;  %v946_v47 = vld [vmem:[%s2441_s0 + $0x300] sm:$0xf]  ;;  %v260_v50 = vmax.f32 %v243_v33, %v943_v42 }
  0x2b   :  { %v947_v48 = vld [vmem:[%s2441_s0 + $0x308] sm:$0xf]  ;;  %v948_v49 = vld [vmem:[%s2441_s0 + $0x310] sm:$0xf]  ;;  %v261_v51 = vmax.f32 %v244_v34, %v944_v43  ;;  %v262_v52 = vmax.f32 %v245_v36, %v945_v44  ;;  %v263_v53 = vmax.f32 %v246_v37, %v946_v47  ;;  %v949_v56 = vld [vmem:[%s2441_s0 + $0x320] sm:$0xf] }
  0x2c   :  { %v264_v54 = vmax.f32 %v247_v38, %v947_v48  ;;  %v265_v55 = vmax.f32 %v248_v41, %v948_v49  ;;  %v950_v57 = vld [vmem:[%s2441_s0 + $0x328] sm:$0xf]  ;;  %v951_v58 = vld [vmem:[%s2441_s0 + $0x330] sm:$0xf]  ;;  %v952_v59 = vld [vmem:[%s2441_s0 + $0x338] sm:$0xf]  ;;  %v275_v62 = vmax.f32 %v258_v45, %v949_v56 }
  0x2d   :  { %v953_v60 = vld [vmem:[%s2441_s0 + $0x348] sm:$0xf]  ;;  %v954_v61 = vld [vmem:[%s2441_s0 + $0x350] sm:$0xf]  ;;  %v276_v63 = vmax.f32 %v259_v46, %v950_v57  ;;  %v277_v0 = vmax.f32 %v260_v50, %v951_v58  ;;  %v955_v1 = vld [vmem:[%s2441_s0 + $0x358] sm:$0xf]  ;;  %v278_v3 = vmax.f32 %v261_v51, %v952_v59 }
  0x2e   :  { %v956_v2 = vld [vmem:[%s2441_s0 + $0x360] sm:$0xf]  ;;  %v279_v4 = vmax.f32 %v262_v52, %v953_v60  ;;  %v280_v5 = vmax.f32 %v263_v53, %v954_v61  ;;  %v957_v6 = vld [vmem:[%s2441_s0 + $0x370] sm:$0xf]  ;;  %v281_v7 = vmax.f32 %v264_v54, %v955_v1  ;;  %v958_v9 = vld [vmem:[%s2441_s0 + $0x378] sm:$0xf] }
  0x2f   :  { %v282_v8 = vmax.f32 %v265_v55, %v956_v2  ;;  %v959_v10 = vld [vmem:[%s2441_s0 + $0x380] sm:$0xf]  ;;  %v960_v11 = vld [vmem:[%s2441_s0 + $0x388] sm:$0xf]  ;;  %v292_v12 = vmax.f32 %v275_v62, %v957_v6  ;;  %v961_v13 = vld [vmem:[%s2441_s0 + $0x398] sm:$0xf]  ;;  %v293_v16 = vmax.f32 %v276_v63, %v958_v9 }
  0x30   :  { %v962_v14 = vld [vmem:[%s2441_s0 + $0x3a0] sm:$0xf]  ;;  %v963_v15 = vld [vmem:[%s2441_s0 + $0x3a8] sm:$0xf]  ;;  %v294_v17 = vmax.f32 %v277_v0, %v959_v10  ;;  %v295_v18 = vmax.f32 %v278_v3, %v960_v11  ;;  %v964_v19 = vld [vmem:[%s2441_s0 + $0x3b0] sm:$0xf]  ;;  %v296_v20 = vmax.f32 %v279_v4, %v961_v13 }
  0x31   :  { %v297_v21 = vmax.f32 %v280_v5, %v962_v14  ;;  %v298_v22 = vmax.f32 %v281_v7, %v963_v15  ;;  %v965_v23 = vld [vmem:[%s2441_s0 + $0x281] sm:$0xf]  ;;  %v966_v24 = vld [vmem:[%s2441_s0 + $0x289] sm:$0xf]  ;;  %v299_v25 = vmax.f32 %v282_v8, %v964_v19  ;;  %v967_v26 = vld [vmem:[%s2441_s0 + $0x291] sm:$0xf] }
  0x32   :  { %v968_v27 = vld [vmem:[%s2441_s0 + $0x299] sm:$0xf]  ;;  %v969_v28 = vld [vmem:[%s2441_s0 + $0x2a9] sm:$0xf]  ;;  %v308_v29 = vmax.f32 %v292_v12, %v965_v23  ;;  %v309_v30 = vmax.f32 %v293_v16, %v966_v24  ;;  %v970_v31 = vld [vmem:[%s2441_s0 + $0x2b1] sm:$0xf]  ;;  %v310_v34 = vmax.f32 %v294_v17, %v967_v26 }
  0x33   :  { %v971_v32 = vld [vmem:[%s2441_s0 + $0x2b9] sm:$0xf]  ;;  %v972_v33 = vld [vmem:[%s2441_s0 + $0x2c1] sm:$0xf]  ;;  %v311_v35 = vmax.f32 %v295_v18, %v968_v27  ;;  %v312_v36 = vmax.f32 %v296_v20, %v969_v28  ;;  %v313_v37 = vmax.f32 %v297_v21, %v970_v31  ;;  %v973_v40 = vld [vmem:[%s2441_s0 + $0x2d1] sm:$0xf] }
  0x34   :  { %v314_v38 = vmax.f32 %v298_v22, %v971_v32  ;;  %v315_v39 = vmax.f32 %v299_v25, %v972_v33  ;;  %v974_v41 = vld [vmem:[%s2441_s0 + $0x2d9] sm:$0xf]  ;;  %v975_v42 = vld [vmem:[%s2441_s0 + $0x2e1] sm:$0xf]  ;;  %v976_v43 = vld [vmem:[%s2441_s0 + $0x2e9] sm:$0xf]  ;;  %v324_v46 = vmax.f32 %v308_v29, %v973_v40 }
  0x35   :  { %v977_v44 = vld [vmem:[%s2441_s0 + $0x2f9] sm:$0xf]  ;;  %v978_v45 = vld [vmem:[%s2441_s0 + $0x301] sm:$0xf]  ;;  %v325_v47 = vmax.f32 %v309_v30, %v974_v41  ;;  %v326_v48 = vmax.f32 %v310_v34, %v975_v42  ;;  %v979_v49 = vld [vmem:[%s2441_s0 + $0x309] sm:$0xf]  ;;  %v327_v51 = vmax.f32 %v311_v35, %v976_v43 }
  0x36   :  { %v980_v50 = vld [vmem:[%s2441_s0 + $0x311] sm:$0xf]  ;;  %v328_v52 = vmax.f32 %v312_v36, %v977_v44  ;;  %v329_v53 = vmax.f32 %v313_v37, %v978_v45  ;;  %v981_v54 = vld [vmem:[%s2441_s0 + $0x321] sm:$0xf]  ;;  %v330_v55 = vmax.f32 %v314_v38, %v979_v49  ;;  %v982_v57 = vld [vmem:[%s2441_s0 + $0x329] sm:$0xf] }
  0x37   :  { %v331_v56 = vmax.f32 %v315_v39, %v980_v50  ;;  %v983_v58 = vld [vmem:[%s2441_s0 + $0x331] sm:$0xf]  ;;  %v984_v59 = vld [vmem:[%s2441_s0 + $0x339] sm:$0xf]  ;;  %v340_v60 = vmax.f32 %v324_v46, %v981_v54  ;;  %v985_v61 = vld [vmem:[%s2441_s0 + $0x349] sm:$0xf]  ;;  %v341_v0 = vmax.f32 %v325_v47, %v982_v57 }
  0x38   :  { %v986_v62 = vld [vmem:[%s2441_s0 + $0x351] sm:$0xf]  ;;  %v987_v63 = vld [vmem:[%s2441_s0 + $0x359] sm:$0xf]  ;;  %v342_v1 = vmax.f32 %v326_v48, %v983_v58  ;;  %v343_v2 = vmax.f32 %v327_v51, %v984_v59  ;;  %v988_v3 = vld [vmem:[%s2441_s0 + $0x361] sm:$0xf]  ;;  %v344_v4 = vmax.f32 %v328_v52, %v985_v61 }
  0x39   :  { %v345_v5 = vmax.f32 %v329_v53, %v986_v62  ;;  %v346_v6 = vmax.f32 %v330_v55, %v987_v63  ;;  %v989_v7 = vld [vmem:[%s2441_s0 + $0x3c0] sm:$0xf]  ;;  %v990_v8 = vld [vmem:[%s2441_s0 + $0x3c8] sm:$0xf]  ;;  %v347_v9 = vmax.f32 %v331_v56, %v988_v3  ;;  %v991_v10 = vld [vmem:[%s2441_s0 + $0x3d0] sm:$0xf] }
  0x3a   :  { %v992_v11 = vld [vmem:[%s2441_s0 + $0x3d8] sm:$0xf]  ;;  %v993_v12 = vld [vmem:[%s2441_s0 + $0x3e8] sm:$0xf]  ;;  %v357_v13 = vmax.f32 %v340_v60, %v989_v7  ;;  %v358_v14 = vmax.f32 %v341_v0, %v990_v8  ;;  %v994_v15 = vld [vmem:[%s2441_s0 + $0x3f0] sm:$0xf]  ;;  %v359_v18 = vmax.f32 %v342_v1, %v991_v10 }
  0x3b   :  { %v995_v16 = vld [vmem:[%s2441_s0 + $0x3f8] sm:$0xf]  ;;  %v996_v17 = vld [vmem:[%s2441_s0 + $0x400] sm:$0xf]  ;;  %v360_v19 = vmax.f32 %v343_v2, %v992_v11  ;;  %v361_v20 = vmax.f32 %v344_v4, %v993_v12  ;;  %v362_v21 = vmax.f32 %v345_v5, %v994_v15  ;;  %v997_v24 = vld [vmem:[%s2441_s0 + $0x410] sm:$0xf] }
  0x3c   :  { %v363_v22 = vmax.f32 %v346_v6, %v995_v16  ;;  %v364_v23 = vmax.f32 %v347_v9, %v996_v17  ;;  %v998_v25 = vld [vmem:[%s2441_s0 + $0x418] sm:$0xf]  ;;  %v999_v26 = vld [vmem:[%s2441_s0 + $0x420] sm:$0xf]  ;;  %v1000_v27 = vld [vmem:[%s2441_s0 + $0x428] sm:$0xf]  ;;  %v374_v30 = vmax.f32 %v357_v13, %v997_v24 }
  0x3d   :  { %v1001_v28 = vld [vmem:[%s2441_s0 + $0x438] sm:$0xf]  ;;  %v1002_v29 = vld [vmem:[%s2441_s0 + $0x440] sm:$0xf]  ;;  %v375_v31 = vmax.f32 %v358_v14, %v998_v25  ;;  %v376_v32 = vmax.f32 %v359_v18, %v999_v26  ;;  %v1003_v33 = vld [vmem:[%s2441_s0 + $0x448] sm:$0xf]  ;;  %v377_v35 = vmax.f32 %v360_v19, %v1000_v27 }
  0x3e   :  { %v1004_v34 = vld [vmem:[%s2441_s0 + $0x450] sm:$0xf]  ;;  %v378_v36 = vmax.f32 %v361_v20, %v1001_v28  ;;  %v379_v37 = vmax.f32 %v362_v21, %v1002_v29  ;;  %v1005_v38 = vld [vmem:[%s2441_s0 + $0x460] sm:$0xf]  ;;  %v380_v39 = vmax.f32 %v363_v22, %v1003_v33  ;;  %v1006_v41 = vld [vmem:[%s2441_s0 + $0x468] sm:$0xf] }
  0x3f   :  { %v381_v40 = vmax.f32 %v364_v23, %v1004_v34  ;;  %v1007_v42 = vld [vmem:[%s2441_s0 + $0x470] sm:$0xf]  ;;  %v1008_v43 = vld [vmem:[%s2441_s0 + $0x478] sm:$0xf]  ;;  %v391_v44 = vmax.f32 %v374_v30, %v1005_v38  ;;  %v1009_v45 = vld [vmem:[%s2441_s0 + $0x488] sm:$0xf]  ;;  %v392_v48 = vmax.f32 %v375_v31, %v1006_v41 }
  0x40   :  { %v1010_v46 = vld [vmem:[%s2441_s0 + $0x490] sm:$0xf]  ;;  %v1011_v47 = vld [vmem:[%s2441_s0 + $0x498] sm:$0xf]  ;;  %v393_v49 = vmax.f32 %v376_v32, %v1007_v42  ;;  %v394_v50 = vmax.f32 %v377_v35, %v1008_v43  ;;  %v1012_v51 = vld [vmem:[%s2441_s0 + $0x4a0] sm:$0xf]  ;;  %v395_v52 = vmax.f32 %v378_v36, %v1009_v45 }
  0x41   :  { %v396_v53 = vmax.f32 %v379_v37, %v1010_v46  ;;  %v397_v54 = vmax.f32 %v380_v39, %v1011_v47  ;;  %v1013_v55 = vld [vmem:[%s2441_s0 + $0x4b0] sm:$0xf]  ;;  %v1014_v56 = vld [vmem:[%s2441_s0 + $0x4b8] sm:$0xf]  ;;  %v398_v57 = vmax.f32 %v381_v40, %v1012_v51  ;;  %v1015_v58 = vld [vmem:[%s2441_s0 + $0x4c0] sm:$0xf] }
  0x42   :  { %v1016_v59 = vld [vmem:[%s2441_s0 + $0x4c8] sm:$0xf]  ;;  %v1017_v60 = vld [vmem:[%s2441_s0 + $0x4d8] sm:$0xf]  ;;  %v408_v61 = vmax.f32 %v391_v44, %v1013_v55  ;;  %v409_v62 = vmax.f32 %v392_v48, %v1014_v56  ;;  %v1018_v63 = vld [vmem:[%s2441_s0 + $0x4e0] sm:$0xf]  ;;  %v410_v2 = vmax.f32 %v393_v49, %v1015_v58 }
  0x43   :  { %v1019_v0 = vld [vmem:[%s2441_s0 + $0x4e8] sm:$0xf]  ;;  %v1020_v1 = vld [vmem:[%s2441_s0 + $0x4f0] sm:$0xf]  ;;  %v411_v3 = vmax.f32 %v394_v50, %v1016_v59  ;;  %v412_v4 = vmax.f32 %v395_v52, %v1017_v60  ;;  %v413_v5 = vmax.f32 %v396_v53, %v1018_v63  ;;  %v1021_v8 = vld [vmem:[%s2441_s0 + $0x3c1] sm:$0xf] }
  0x44   :  { %v414_v6 = vmax.f32 %v397_v54, %v1019_v0  ;;  %v415_v7 = vmax.f32 %v398_v57, %v1020_v1  ;;  %v1022_v9 = vld [vmem:[%s2441_s0 + $0x3c9] sm:$0xf]  ;;  %v1023_v10 = vld [vmem:[%s2441_s0 + $0x3d1] sm:$0xf]  ;;  %v1024_v11 = vld [vmem:[%s2441_s0 + $0x3d9] sm:$0xf]  ;;  %v424_v14 = vmax.f32 %v408_v61, %v1021_v8 }
  0x45   :  { %v1025_v12 = vld [vmem:[%s2441_s0 + $0x3e9] sm:$0xf]  ;;  %v1026_v13 = vld [vmem:[%s2441_s0 + $0x3f1] sm:$0xf]  ;;  %v425_v15 = vmax.f32 %v409_v62, %v1022_v9  ;;  %v426_v16 = vmax.f32 %v410_v2, %v1023_v10  ;;  %v1027_v17 = vld [vmem:[%s2441_s0 + $0x3f9] sm:$0xf]  ;;  %v427_v19 = vmax.f32 %v411_v3, %v1024_v11 }
  0x46   :  { %v1028_v18 = vld [vmem:[%s2441_s0 + $0x401] sm:$0xf]  ;;  %v428_v20 = vmax.f32 %v412_v4, %v1025_v12  ;;  %v429_v21 = vmax.f32 %v413_v5, %v1026_v13  ;;  %v1029_v22 = vld [vmem:[%s2441_s0 + $0x411] sm:$0xf]  ;;  %v430_v23 = vmax.f32 %v414_v6, %v1027_v17  ;;  %v1030_v25 = vld [vmem:[%s2441_s0 + $0x419] sm:$0xf] }
  0x47   :  { %v431_v24 = vmax.f32 %v415_v7, %v1028_v18  ;;  %v1031_v26 = vld [vmem:[%s2441_s0 + $0x421] sm:$0xf]  ;;  %v1032_v27 = vld [vmem:[%s2441_s0 + $0x429] sm:$0xf]  ;;  %v440_v28 = vmax.f32 %v424_v14, %v1029_v22  ;;  %v1033_v29 = vld [vmem:[%s2441_s0 + $0x439] sm:$0xf]  ;;  %v441_v32 = vmax.f32 %v425_v15, %v1030_v25 }
  0x48   :  { %v1034_v30 = vld [vmem:[%s2441_s0 + $0x441] sm:$0xf]  ;;  %v1035_v31 = vld [vmem:[%s2441_s0 + $0x449] sm:$0xf]  ;;  %v442_v33 = vmax.f32 %v426_v16, %v1031_v26  ;;  %v443_v34 = vmax.f32 %v427_v19, %v1032_v27  ;;  %v1036_v35 = vld [vmem:[%s2441_s0 + $0x451] sm:$0xf]  ;;  %v444_v36 = vmax.f32 %v428_v20, %v1033_v29 }
  0x49   :  { %v445_v37 = vmax.f32 %v429_v21, %v1034_v30  ;;  %v446_v38 = vmax.f32 %v430_v23, %v1035_v31  ;;  %v1037_v39 = vld [vmem:[%s2441_s0 + $0x461] sm:$0xf]  ;;  %v1038_v40 = vld [vmem:[%s2441_s0 + $0x469] sm:$0xf]  ;;  %v447_v41 = vmax.f32 %v431_v24, %v1036_v35  ;;  %v1039_v42 = vld [vmem:[%s2441_s0 + $0x471] sm:$0xf] }
  0x4a   :  { %v1040_v43 = vld [vmem:[%s2441_s0 + $0x479] sm:$0xf]  ;;  %v1041_v44 = vld [vmem:[%s2441_s0 + $0x489] sm:$0xf]  ;;  %v456_v45 = vmax.f32 %v440_v28, %v1037_v39  ;;  %v457_v46 = vmax.f32 %v441_v32, %v1038_v40  ;;  %v1042_v47 = vld [vmem:[%s2441_s0 + $0x491] sm:$0xf]  ;;  %v458_v50 = vmax.f32 %v442_v33, %v1039_v42 }
  0x4b   :  { %v1043_v48 = vld [vmem:[%s2441_s0 + $0x499] sm:$0xf]  ;;  %v1044_v49 = vld [vmem:[%s2441_s0 + $0x4a1] sm:$0xf]  ;;  %v459_v51 = vmax.f32 %v443_v34, %v1040_v43  ;;  %v460_v52 = vmax.f32 %v444_v36, %v1041_v44  ;;  %v461_v53 = vmax.f32 %v445_v37, %v1042_v47  ;;  %v1045_v56 = vld [vmem:[%s2441_s0 + $0x8] sm:$0xf] }
  0x4c   :  { %v462_v54 = vmax.f32 %v446_v38, %v1043_v48  ;;  %v463_v55 = vmax.f32 %v447_v41, %v1044_v49  ;;  %v1046_v57 = vld [vmem:[%s2441_s0 + $0x10] sm:$0xf]  ;;  %v1047_v58 = vld [vmem:[%s2441_s0 + $0x18] sm:$0xf]  ;;  %v1048_v59 = vld [vmem:[%s2441_s0 + $0x20] sm:$0xf]  ;;  %v473_v62 = vmax.f32 %v456_v45, %v1045_v56 }
  0x4d   :  { %v1049_v60 = vld [vmem:[%s2441_s0 + $0x30] sm:$0xf]  ;;  %v1050_v61 = vld [vmem:[%s2441_s0 + $0x38] sm:$0xf]  ;;  %v474_v63 = vmax.f32 %v457_v46, %v1046_v57  ;;  %v475_v0 = vmax.f32 %v458_v50, %v1047_v58  ;;  %v1051_v1 = vld [vmem:[%s2441_s0 + $0x40] sm:$0xf]  ;;  %v476_v3 = vmax.f32 %v459_v51, %v1048_v59 }
  0x4e   :  { %v1052_v2 = vld [vmem:[%s2441_s0 + $0x48] sm:$0xf]  ;;  %v477_v4 = vmax.f32 %v460_v52, %v1049_v60  ;;  %v478_v5 = vmax.f32 %v461_v53, %v1050_v61  ;;  %v1053_v6 = vld [vmem:[%s2441_s0 + $0x58] sm:$0xf]  ;;  %v479_v7 = vmax.f32 %v462_v54, %v1051_v1  ;;  %v1054_v9 = vld [vmem:[%s2441_s0 + $0x60] sm:$0xf] }
  0x4f   :  { %v480_v8 = vmax.f32 %v463_v55, %v1052_v2  ;;  %v1055_v10 = vld [vmem:[%s2441_s0 + $0x68] sm:$0xf]  ;;  %v1056_v11 = vld [vmem:[%s2441_s0 + $0x70] sm:$0xf]  ;;  %v490_v12 = vmax.f32 %v473_v62, %v1053_v6  ;;  %v1057_v13 = vld [vmem:[%s2441_s0 + $0x80] sm:$0xf]  ;;  %v491_v16 = vmax.f32 %v474_v63, %v1054_v9 }
  0x50   :  { %v1058_v14 = vld [vmem:[%s2441_s0 + $0x88] sm:$0xf]  ;;  %v1059_v15 = vld [vmem:[%s2441_s0 + $0x90] sm:$0xf]  ;;  %v492_v17 = vmax.f32 %v475_v0, %v1055_v10  ;;  %v493_v18 = vmax.f32 %v476_v3, %v1056_v11  ;;  %v1060_v19 = vld [vmem:[%s2441_s0 + $0x98] sm:$0xf]  ;;  %v494_v20 = vmax.f32 %v477_v4, %v1057_v13 }
  0x51   :  { %v495_v21 = vmax.f32 %v478_v5, %v1058_v14  ;;  %v496_v22 = vmax.f32 %v479_v7, %v1059_v15  ;;  %v1061_v23 = vld [vmem:[%s2441_s0 + $0xa8] sm:$0xf]  ;;  %v1062_v24 = vld [vmem:[%s2441_s0 + $0xb0] sm:$0xf]  ;;  %v497_v25 = vmax.f32 %v480_v8, %v1060_v19  ;;  %v1063_v26 = vld [vmem:[%s2441_s0 + $0xb8] sm:$0xf] }
  0x52   :  { %v1064_v27 = vld [vmem:[%s2441_s0 + $0xc0] sm:$0xf]  ;;  %v1065_v28 = vld [vmem:[%s2441_s0 + $0xd0] sm:$0xf]  ;;  %v507_v29 = vmax.f32 %v490_v12, %v1061_v23  ;;  %v508_v30 = vmax.f32 %v491_v16, %v1062_v24  ;;  %v1066_v31 = vld [vmem:[%s2441_s0 + $0xd8] sm:$0xf]  ;;  %v509_v34 = vmax.f32 %v492_v17, %v1063_v26 }
  0x53   :  { %v1067_v32 = vld [vmem:[%s2441_s0 + $0xe0] sm:$0xf]  ;;  %v1068_v33 = vld [vmem:[%s2441_s0 + $0xe8] sm:$0xf]  ;;  %v510_v35 = vmax.f32 %v493_v18, %v1064_v27  ;;  %v511_v36 = vmax.f32 %v494_v20, %v1065_v28  ;;  %v512_v37 = vmax.f32 %v495_v21, %v1066_v31  ;;  %v1069_v40 = vld [vmem:[%s2441_s0 + $0xf8] sm:$0xf] }
  0x54   :  { %v513_v38 = vmax.f32 %v496_v22, %v1067_v32  ;;  %v514_v39 = vmax.f32 %v497_v25, %v1068_v33  ;;  %v1070_v41 = vld [vmem:[%s2441_s0 + $0x100] sm:$0xf]  ;;  %v1071_v42 = vld [vmem:[%s2441_s0 + $0x108] sm:$0xf]  ;;  %v1072_v43 = vld [vmem:[%s2441_s0 + $0x110] sm:$0xf]  ;;  %v524_v46 = vmax.f32 %v507_v29, %v1069_v40 }
  0x55   :  { %v1073_v44 = vld [vmem:[%s2441_s0 + $0x120] sm:$0xf]  ;;  %v1074_v45 = vld [vmem:[%s2441_s0 + $0x128] sm:$0xf]  ;;  %v525_v47 = vmax.f32 %v508_v30, %v1070_v41  ;;  %v526_v48 = vmax.f32 %v509_v34, %v1071_v42  ;;  %v1075_v49 = vld [vmem:[%s2441_s0 + $0x130] sm:$0xf]  ;;  %v527_v51 = vmax.f32 %v510_v35, %v1072_v43 }
  0x56   :  { %v1076_v50 = vld [vmem:[%s2441_s0 + $0x138] sm:$0xf]  ;;  %v528_v52 = vmax.f32 %v511_v36, %v1073_v44  ;;  %v529_v53 = vmax.f32 %v512_v37, %v1074_v45  ;;  %v1077_v54 = vld [vmem:[%s2441_s0 + $0x9] sm:$0xf]  ;;  %v530_v55 = vmax.f32 %v513_v38, %v1075_v49  ;;  %v1078_v57 = vld [vmem:[%s2441_s0 + $0x11] sm:$0xf] }
  0x57   :  { %v531_v56 = vmax.f32 %v514_v39, %v1076_v50  ;;  %v1079_v58 = vld [vmem:[%s2441_s0 + $0x19] sm:$0xf]  ;;  %v1080_v59 = vld [vmem:[%s2441_s0 + $0x21] sm:$0xf]  ;;  %v540_v60 = vmax.f32 %v524_v46, %v1077_v54  ;;  %v1081_v61 = vld [vmem:[%s2441_s0 + $0x31] sm:$0xf]  ;;  %v541_v0 = vmax.f32 %v525_v47, %v1078_v57 }
  0x58   :  { %v1082_v62 = vld [vmem:[%s2441_s0 + $0x39] sm:$0xf]  ;;  %v1083_v63 = vld [vmem:[%s2441_s0 + $0x41] sm:$0xf]  ;;  %v542_v1 = vmax.f32 %v526_v48, %v1079_v58  ;;  %v543_v2 = vmax.f32 %v527_v51, %v1080_v59  ;;  %v1084_v3 = vld [vmem:[%s2441_s0 + $0x49] sm:$0xf]  ;;  %v544_v4 = vmax.f32 %v528_v52, %v1081_v61 }
  0x59   :  { %v545_v5 = vmax.f32 %v529_v53, %v1082_v62  ;;  %v546_v6 = vmax.f32 %v530_v55, %v1083_v63  ;;  %v1085_v7 = vld [vmem:[%s2441_s0 + $0x59] sm:$0xf]  ;;  %v1086_v8 = vld [vmem:[%s2441_s0 + $0x61] sm:$0xf]  ;;  %v547_v9 = vmax.f32 %v531_v56, %v1084_v3  ;;  %v1087_v10 = vld [vmem:[%s2441_s0 + $0x69] sm:$0xf] }
  0x5a   :  { %v1088_v11 = vld [vmem:[%s2441_s0 + $0x71] sm:$0xf]  ;;  %v1089_v12 = vld [vmem:[%s2441_s0 + $0x81] sm:$0xf]  ;;  %v556_v13 = vmax.f32 %v540_v60, %v1085_v7  ;;  %v557_v14 = vmax.f32 %v541_v0, %v1086_v8  ;;  %v1090_v15 = vld [vmem:[%s2441_s0 + $0x89] sm:$0xf]  ;;  %v558_v18 = vmax.f32 %v542_v1, %v1087_v10 }
  0x5b   :  { %v1091_v16 = vld [vmem:[%s2441_s0 + $0x91] sm:$0xf]  ;;  %v1092_v17 = vld [vmem:[%s2441_s0 + $0x99] sm:$0xf]  ;;  %v559_v19 = vmax.f32 %v543_v2, %v1088_v11  ;;  %v560_v20 = vmax.f32 %v544_v4, %v1089_v12  ;;  %v561_v21 = vmax.f32 %v545_v5, %v1090_v15  ;;  %v1093_v24 = vld [vmem:[%s2441_s0 + $0xa9] sm:$0xf] }
  0x5c   :  { %v562_v22 = vmax.f32 %v546_v6, %v1091_v16  ;;  %v563_v23 = vmax.f32 %v547_v9, %v1092_v17  ;;  %v1094_v25 = vld [vmem:[%s2441_s0 + $0xb1] sm:$0xf]  ;;  %v1095_v26 = vld [vmem:[%s2441_s0 + $0xb9] sm:$0xf]  ;;  %v1096_v27 = vld [vmem:[%s2441_s0 + $0xc1] sm:$0xf]  ;;  %v572_v30 = vmax.f32 %v556_v13, %v1093_v24 }
  0x5d   :  { %v1097_v28 = vld [vmem:[%s2441_s0 + $0xd1] sm:$0xf]  ;;  %v1098_v29 = vld [vmem:[%s2441_s0 + $0xd9] sm:$0xf]  ;;  %v573_v31 = vmax.f32 %v557_v14, %v1094_v25  ;;  %v574_v32 = vmax.f32 %v558_v18, %v1095_v26  ;;  %v1099_v33 = vld [vmem:[%s2441_s0 + $0xe1] sm:$0xf]  ;;  %v575_v35 = vmax.f32 %v559_v19, %v1096_v27 }
  0x5e   :  { %v1100_v34 = vld [vmem:[%s2441_s0 + $0xe9] sm:$0xf]  ;;  %v576_v36 = vmax.f32 %v560_v20, %v1097_v28  ;;  %v577_v37 = vmax.f32 %v561_v21, %v1098_v29  ;;  %v578_v39 = vmax.f32 %v562_v22, %v1099_v33  ;;  %v1102_v41 = vld [vmem:[%s2441_s0 + $0x150] sm:$0xf]  ;;  %v1103_v42 = vld [vmem:[%s2441_s0 + $0x158] sm:$0xf] }
  0x5f   :  { %v1101_v38 = vld [vmem:[%s2441_s0 + $0x148] sm:$0xf]  ;;  %v579_v40 = vmax.f32 %v563_v23, %v1100_v34  ;;  %v1104_v43 = vld [vmem:[%s2441_s0 + $0x160] sm:$0xf]  ;;  %v1105_v45 = vld [vmem:[%s2441_s0 + $0x170] sm:$0xf]  ;;  %v590_v48 = vmax.f32 %v573_v31, %v1102_v41  ;;  %v591_v49 = vmax.f32 %v574_v32, %v1103_v42 }
  0x60   :  { %v589_v44 = vmax.f32 %v572_v30, %v1101_v38  ;;  %v1106_v46 = vld [vmem:[%s2441_s0 + $0x178] sm:$0xf]  ;;  %v1107_v47 = vld [vmem:[%s2441_s0 + $0x180] sm:$0xf]  ;;  %v592_v50 = vmax.f32 %v575_v35, %v1104_v43  ;;  %v1108_v51 = vld [vmem:[%s2441_s0 + $0x188] sm:$0xf]  ;;  %v593_v52 = vmax.f32 %v576_v36, %v1105_v45 }
  0x61   :  { %v594_v53 = vmax.f32 %v577_v37, %v1106_v46  ;;  %v595_v54 = vmax.f32 %v578_v39, %v1107_v47  ;;  %v1109_v55 = vld [vmem:[%s2441_s0 + $0x198] sm:$0xf]  ;;  %v1110_v56 = vld [vmem:[%s2441_s0 + $0x1a0] sm:$0xf]  ;;  %v596_v57 = vmax.f32 %v579_v40, %v1108_v51  ;;  %v1111_v58 = vld [vmem:[%s2441_s0 + $0x1a8] sm:$0xf] }
  0x62   :  { %v1112_v59 = vld [vmem:[%s2441_s0 + $0x1b0] sm:$0xf]  ;;  %v1113_v60 = vld [vmem:[%s2441_s0 + $0x1c0] sm:$0xf]  ;;  %v606_v61 = vmax.f32 %v589_v44, %v1109_v55  ;;  %v607_v62 = vmax.f32 %v590_v48, %v1110_v56  ;;  %v1114_v63 = vld [vmem:[%s2441_s0 + $0x1c8] sm:$0xf]  ;;  %v608_v2 = vmax.f32 %v591_v49, %v1111_v58 }
  0x63   :  { %v1115_v0 = vld [vmem:[%s2441_s0 + $0x1d0] sm:$0xf]  ;;  %v1116_v1 = vld [vmem:[%s2441_s0 + $0x1d8] sm:$0xf]  ;;  %v609_v3 = vmax.f32 %v592_v50, %v1112_v59  ;;  %v610_v4 = vmax.f32 %v593_v52, %v1113_v60  ;;  %v611_v5 = vmax.f32 %v594_v53, %v1114_v63  ;;  %v1117_v8 = vld [vmem:[%s2441_s0 + $0x1e8] sm:$0xf] }
  0x64   :  { %v612_v6 = vmax.f32 %v595_v54, %v1115_v0  ;;  %v613_v7 = vmax.f32 %v596_v57, %v1116_v1  ;;  %v1118_v9 = vld [vmem:[%s2441_s0 + $0x1f0] sm:$0xf]  ;;  %v1119_v10 = vld [vmem:[%s2441_s0 + $0x1f8] sm:$0xf]  ;;  %v1120_v11 = vld [vmem:[%s2441_s0 + $0x200] sm:$0xf]  ;;  %v623_v14 = vmax.f32 %v606_v61, %v1117_v8 }
  0x65   :  { %v1121_v12 = vld [vmem:[%s2441_s0 + $0x210] sm:$0xf]  ;;  %v1122_v13 = vld [vmem:[%s2441_s0 + $0x218] sm:$0xf]  ;;  %v624_v15 = vmax.f32 %v607_v62, %v1118_v9  ;;  %v625_v16 = vmax.f32 %v608_v2, %v1119_v10  ;;  %v1123_v17 = vld [vmem:[%s2441_s0 + $0x220] sm:$0xf]  ;;  %v626_v19 = vmax.f32 %v609_v3, %v1120_v11 }
  0x66   :  { %v1124_v18 = vld [vmem:[%s2441_s0 + $0x228] sm:$0xf]  ;;  %v627_v20 = vmax.f32 %v610_v4, %v1121_v12  ;;  %v628_v21 = vmax.f32 %v611_v5, %v1122_v13  ;;  %v1125_v22 = vld [vmem:[%s2441_s0 + $0x238] sm:$0xf]  ;;  %v629_v23 = vmax.f32 %v612_v6, %v1123_v17  ;;  %v1126_v25 = vld [vmem:[%s2441_s0 + $0x240] sm:$0xf] }
  0x67   :  { %v630_v24 = vmax.f32 %v613_v7, %v1124_v18  ;;  %v1127_v26 = vld [vmem:[%s2441_s0 + $0x248] sm:$0xf]  ;;  %v1128_v27 = vld [vmem:[%s2441_s0 + $0x250] sm:$0xf]  ;;  %v640_v28 = vmax.f32 %v623_v14, %v1125_v22  ;;  %v1129_v29 = vld [vmem:[%s2441_s0 + $0x260] sm:$0xf]  ;;  %v641_v32 = vmax.f32 %v624_v15, %v1126_v25 }
  0x68   :  { %v1130_v30 = vld [vmem:[%s2441_s0 + $0x268] sm:$0xf]  ;;  %v1131_v31 = vld [vmem:[%s2441_s0 + $0x270] sm:$0xf]  ;;  %v642_v33 = vmax.f32 %v625_v16, %v1127_v26  ;;  %v643_v34 = vmax.f32 %v626_v19, %v1128_v27  ;;  %v1132_v35 = vld [vmem:[%s2441_s0 + $0x278] sm:$0xf]  ;;  %v644_v36 = vmax.f32 %v627_v20, %v1129_v29 }
  0x69   :  { %v645_v37 = vmax.f32 %v628_v21, %v1130_v30  ;;  %v646_v38 = vmax.f32 %v629_v23, %v1131_v31  ;;  %v1133_v39 = vld [vmem:[%s2441_s0 + $0x149] sm:$0xf]  ;;  %v1134_v40 = vld [vmem:[%s2441_s0 + $0x151] sm:$0xf]  ;;  %v647_v41 = vmax.f32 %v630_v24, %v1132_v35  ;;  %v1135_v42 = vld [vmem:[%s2441_s0 + $0x159] sm:$0xf] }
  0x6a   :  { %v1136_v43 = vld [vmem:[%s2441_s0 + $0x161] sm:$0xf]  ;;  %v1137_v44 = vld [vmem:[%s2441_s0 + $0x171] sm:$0xf]  ;;  %v656_v45 = vmax.f32 %v640_v28, %v1133_v39  ;;  %v657_v46 = vmax.f32 %v641_v32, %v1134_v40  ;;  %v1138_v47 = vld [vmem:[%s2441_s0 + $0x179] sm:$0xf]  ;;  %v658_v50 = vmax.f32 %v642_v33, %v1135_v42 }
  0x6b   :  { %v1139_v48 = vld [vmem:[%s2441_s0 + $0x181] sm:$0xf]  ;;  %v1140_v49 = vld [vmem:[%s2441_s0 + $0x189] sm:$0xf]  ;;  %v659_v51 = vmax.f32 %v643_v34, %v1136_v43  ;;  %v660_v52 = vmax.f32 %v644_v36, %v1137_v44  ;;  %v661_v53 = vmax.f32 %v645_v37, %v1138_v47  ;;  %v1141_v56 = vld [vmem:[%s2441_s0 + $0x199] sm:$0xf] }
  0x6c   :  { %v662_v54 = vmax.f32 %v646_v38, %v1139_v48  ;;  %v663_v55 = vmax.f32 %v647_v41, %v1140_v49  ;;  %v1142_v57 = vld [vmem:[%s2441_s0 + $0x1a1] sm:$0xf]  ;;  %v1143_v58 = vld [vmem:[%s2441_s0 + $0x1a9] sm:$0xf]  ;;  %v1144_v59 = vld [vmem:[%s2441_s0 + $0x1b1] sm:$0xf]  ;;  %v672_v62 = vmax.f32 %v656_v45, %v1141_v56 }
  0x6d   :  { %v1145_v60 = vld [vmem:[%s2441_s0 + $0x1c1] sm:$0xf]  ;;  %v1146_v61 = vld [vmem:[%s2441_s0 + $0x1c9] sm:$0xf]  ;;  %v673_v63 = vmax.f32 %v657_v46, %v1142_v57  ;;  %v674_v0 = vmax.f32 %v658_v50, %v1143_v58  ;;  %v1147_v1 = vld [vmem:[%s2441_s0 + $0x1d1] sm:$0xf]  ;;  %v675_v3 = vmax.f32 %v659_v51, %v1144_v59 }
  0x6e   :  { %v1148_v2 = vld [vmem:[%s2441_s0 + $0x1d9] sm:$0xf]  ;;  %v676_v4 = vmax.f32 %v660_v52, %v1145_v60  ;;  %v677_v5 = vmax.f32 %v661_v53, %v1146_v61  ;;  %v1149_v6 = vld [vmem:[%s2441_s0 + $0x1e9] sm:$0xf]  ;;  %v678_v7 = vmax.f32 %v662_v54, %v1147_v1  ;;  %v1150_v9 = vld [vmem:[%s2441_s0 + $0x1f1] sm:$0xf] }
  0x6f   :  { %v679_v8 = vmax.f32 %v663_v55, %v1148_v2  ;;  %v1151_v10 = vld [vmem:[%s2441_s0 + $0x1f9] sm:$0xf]  ;;  %v1152_v11 = vld [vmem:[%s2441_s0 + $0x201] sm:$0xf]  ;;  %v688_v12 = vmax.f32 %v672_v62, %v1149_v6  ;;  %v1153_v13 = vld [vmem:[%s2441_s0 + $0x211] sm:$0xf]  ;;  %v689_v16 = vmax.f32 %v673_v63, %v1150_v9 }
  0x70   :  { %v1154_v14 = vld [vmem:[%s2441_s0 + $0x219] sm:$0xf]  ;;  %v1155_v15 = vld [vmem:[%s2441_s0 + $0x221] sm:$0xf]  ;;  %v690_v17 = vmax.f32 %v674_v0, %v1151_v10  ;;  %v691_v18 = vmax.f32 %v675_v3, %v1152_v11  ;;  %v1156_v19 = vld [vmem:[%s2441_s0 + $0x229] sm:$0xf]  ;;  %v692_v20 = vmax.f32 %v676_v4, %v1153_v13 }
  0x71   :  { %v693_v21 = vmax.f32 %v677_v5, %v1154_v14  ;;  %v694_v22 = vmax.f32 %v678_v7, %v1155_v15  ;;  %v1157_v23 = vld [vmem:[%s2441_s0 + $0x288] sm:$0xf]  ;;  %v1158_v24 = vld [vmem:[%s2441_s0 + $0x290] sm:$0xf]  ;;  %v695_v25 = vmax.f32 %v679_v8, %v1156_v19  ;;  %v1159_v26 = vld [vmem:[%s2441_s0 + $0x298] sm:$0xf] }
  0x72   :  { %v1160_v27 = vld [vmem:[%s2441_s0 + $0x2a0] sm:$0xf]  ;;  %v1161_v28 = vld [vmem:[%s2441_s0 + $0x2b0] sm:$0xf]  ;;  %v705_v29 = vmax.f32 %v688_v12, %v1157_v23  ;;  %v706_v30 = vmax.f32 %v689_v16, %v1158_v24  ;;  %v1162_v31 = vld [vmem:[%s2441_s0 + $0x2b8] sm:$0xf]  ;;  %v707_v34 = vmax.f32 %v690_v17, %v1159_v26 }
  0x73   :  { %v1163_v32 = vld [vmem:[%s2441_s0 + $0x2c0] sm:$0xf]  ;;  %v1164_v33 = vld [vmem:[%s2441_s0 + $0x2c8] sm:$0xf]  ;;  %v708_v35 = vmax.f32 %v691_v18, %v1160_v27  ;;  %v709_v36 = vmax.f32 %v692_v20, %v1161_v28  ;;  %v710_v37 = vmax.f32 %v693_v21, %v1162_v31  ;;  %v1165_v40 = vld [vmem:[%s2441_s0 + $0x2d8] sm:$0xf] }
  0x74   :  { %v711_v38 = vmax.f32 %v694_v22, %v1163_v32  ;;  %v712_v39 = vmax.f32 %v695_v25, %v1164_v33  ;;  %v1166_v41 = vld [vmem:[%s2441_s0 + $0x2e0] sm:$0xf]  ;;  %v1167_v42 = vld [vmem:[%s2441_s0 + $0x2e8] sm:$0xf]  ;;  %v1168_v43 = vld [vmem:[%s2441_s0 + $0x2f0] sm:$0xf]  ;;  %v722_v46 = vmax.f32 %v705_v29, %v1165_v40 }
  0x75   :  { %v1169_v44 = vld [vmem:[%s2441_s0 + $0x300] sm:$0xf]  ;;  %v1170_v45 = vld [vmem:[%s2441_s0 + $0x308] sm:$0xf]  ;;  %v723_v47 = vmax.f32 %v706_v30, %v1166_v41  ;;  %v724_v48 = vmax.f32 %v707_v34, %v1167_v42  ;;  %v1171_v49 = vld [vmem:[%s2441_s0 + $0x310] sm:$0xf]  ;;  %v725_v51 = vmax.f32 %v708_v35, %v1168_v43 }
  0x76   :  { %v1172_v50 = vld [vmem:[%s2441_s0 + $0x318] sm:$0xf]  ;;  %v726_v52 = vmax.f32 %v709_v36, %v1169_v44  ;;  %v727_v53 = vmax.f32 %v710_v37, %v1170_v45  ;;  %v1173_v54 = vld [vmem:[%s2441_s0 + $0x328] sm:$0xf]  ;;  %v728_v55 = vmax.f32 %v711_v38, %v1171_v49  ;;  %v1174_v57 = vld [vmem:[%s2441_s0 + $0x330] sm:$0xf] }
  0x77   :  { %v729_v56 = vmax.f32 %v712_v39, %v1172_v50  ;;  %v1175_v58 = vld [vmem:[%s2441_s0 + $0x338] sm:$0xf]  ;;  %v1176_v59 = vld [vmem:[%s2441_s0 + $0x340] sm:$0xf]  ;;  %v739_v60 = vmax.f32 %v722_v46, %v1173_v54  ;;  %v1177_v61 = vld [vmem:[%s2441_s0 + $0x350] sm:$0xf]  ;;  %v740_v0 = vmax.f32 %v723_v47, %v1174_v57 }
  0x78   :  { %v1178_v62 = vld [vmem:[%s2441_s0 + $0x358] sm:$0xf]  ;;  %v1179_v63 = vld [vmem:[%s2441_s0 + $0x360] sm:$0xf]  ;;  %v741_v1 = vmax.f32 %v724_v48, %v1175_v58  ;;  %v742_v2 = vmax.f32 %v725_v51, %v1176_v59  ;;  %v1180_v3 = vld [vmem:[%s2441_s0 + $0x368] sm:$0xf]  ;;  %v743_v4 = vmax.f32 %v726_v52, %v1177_v61 }
  0x79   :  { %v744_v5 = vmax.f32 %v727_v53, %v1178_v62  ;;  %v745_v6 = vmax.f32 %v728_v55, %v1179_v63  ;;  %v1181_v7 = vld [vmem:[%s2441_s0 + $0x378] sm:$0xf]  ;;  %v1182_v8 = vld [vmem:[%s2441_s0 + $0x380] sm:$0xf]  ;;  %v746_v9 = vmax.f32 %v729_v56, %v1180_v3  ;;  %v1183_v10 = vld [vmem:[%s2441_s0 + $0x388] sm:$0xf] }
  0x7a   :  { %v1184_v11 = vld [vmem:[%s2441_s0 + $0x390] sm:$0xf]  ;;  %v1185_v12 = vld [vmem:[%s2441_s0 + $0x3a0] sm:$0xf]  ;;  %v756_v13 = vmax.f32 %v739_v60, %v1181_v7  ;;  %v757_v14 = vmax.f32 %v740_v0, %v1182_v8  ;;  %v1186_v15 = vld [vmem:[%s2441_s0 + $0x3a8] sm:$0xf]  ;;  %v758_v18 = vmax.f32 %v741_v1, %v1183_v10 }
  0x7b   :  { %v1187_v16 = vld [vmem:[%s2441_s0 + $0x3b0] sm:$0xf]  ;;  %v1188_v17 = vld [vmem:[%s2441_s0 + $0x3b8] sm:$0xf]  ;;  %v759_v19 = vmax.f32 %v742_v2, %v1184_v11  ;;  %v760_v20 = vmax.f32 %v743_v4, %v1185_v12  ;;  %v761_v21 = vmax.f32 %v744_v5, %v1186_v15  ;;  %v1189_v24 = vld [vmem:[%s2441_s0 + $0x289] sm:$0xf] }
  0x7c   :  { %v762_v22 = vmax.f32 %v745_v6, %v1187_v16  ;;  %v763_v23 = vmax.f32 %v746_v9, %v1188_v17  ;;  %v1190_v25 = vld [vmem:[%s2441_s0 + $0x291] sm:$0xf]  ;;  %v1191_v26 = vld [vmem:[%s2441_s0 + $0x299] sm:$0xf]  ;;  %v1192_v27 = vld [vmem:[%s2441_s0 + $0x2a1] sm:$0xf]  ;;  %v772_v30 = vmax.f32 %v756_v13, %v1189_v24 }
  0x7d   :  { %v1193_v28 = vld [vmem:[%s2441_s0 + $0x2b1] sm:$0xf]  ;;  %v1194_v29 = vld [vmem:[%s2441_s0 + $0x2b9] sm:$0xf]  ;;  %v773_v31 = vmax.f32 %v757_v14, %v1190_v25  ;;  %v774_v32 = vmax.f32 %v758_v18, %v1191_v26  ;;  %v1195_v33 = vld [vmem:[%s2441_s0 + $0x2c1] sm:$0xf]  ;;  %v775_v35 = vmax.f32 %v759_v19, %v1192_v27 }
  0x7e   :  { %v1196_v34 = vld [vmem:[%s2441_s0 + $0x2c9] sm:$0xf]  ;;  %v776_v36 = vmax.f32 %v760_v20, %v1193_v28  ;;  %v777_v37 = vmax.f32 %v761_v21, %v1194_v29  ;;  %v1197_v38 = vld [vmem:[%s2441_s0 + $0x2d9] sm:$0xf]  ;;  %v778_v39 = vmax.f32 %v762_v22, %v1195_v33  ;;  %v1198_v41 = vld [vmem:[%s2441_s0 + $0x2e1] sm:$0xf] }
  0x7f   :  { %v779_v40 = vmax.f32 %v763_v23, %v1196_v34  ;;  %v1199_v42 = vld [vmem:[%s2441_s0 + $0x2e9] sm:$0xf]  ;;  %v1200_v43 = vld [vmem:[%s2441_s0 + $0x2f1] sm:$0xf]  ;;  %v788_v44 = vmax.f32 %v772_v30, %v1197_v38  ;;  %v1201_v45 = vld [vmem:[%s2441_s0 + $0x301] sm:$0xf]  ;;  %v789_v48 = vmax.f32 %v773_v31, %v1198_v41 }
  0x80   :  { %v1202_v46 = vld [vmem:[%s2441_s0 + $0x309] sm:$0xf]  ;;  %v1203_v47 = vld [vmem:[%s2441_s0 + $0x311] sm:$0xf]  ;;  %v790_v49 = vmax.f32 %v774_v32, %v1199_v42  ;;  %v791_v50 = vmax.f32 %v775_v35, %v1200_v43  ;;  %v1204_v51 = vld [vmem:[%s2441_s0 + $0x319] sm:$0xf]  ;;  %v792_v52 = vmax.f32 %v776_v36, %v1201_v45 }
  0x81   :  { %v793_v53 = vmax.f32 %v777_v37, %v1202_v46  ;;  %v794_v54 = vmax.f32 %v778_v39, %v1203_v47  ;;  %v1205_v55 = vld [vmem:[%s2441_s0 + $0x329] sm:$0xf]  ;;  %v1206_v56 = vld [vmem:[%s2441_s0 + $0x331] sm:$0xf]  ;;  %v795_v57 = vmax.f32 %v779_v40, %v1204_v51  ;;  %v1207_v58 = vld [vmem:[%s2441_s0 + $0x339] sm:$0xf] }
  0x82   :  { %v1208_v59 = vld [vmem:[%s2441_s0 + $0x341] sm:$0xf]  ;;  %v1209_v60 = vld [vmem:[%s2441_s0 + $0x351] sm:$0xf]  ;;  %v804_v61 = vmax.f32 %v788_v44, %v1205_v55  ;;  %v805_v62 = vmax.f32 %v789_v48, %v1206_v56  ;;  %v1210_v63 = vld [vmem:[%s2441_s0 + $0x359] sm:$0xf]  ;;  %v806_v2 = vmax.f32 %v790_v49, %v1207_v58 }
  0x83   :  { %v1211_v0 = vld [vmem:[%s2441_s0 + $0x361] sm:$0xf]  ;;  %v1212_v1 = vld [vmem:[%s2441_s0 + $0x369] sm:$0xf]  ;;  %v807_v3 = vmax.f32 %v791_v50, %v1208_v59  ;;  %v808_v4 = vmax.f32 %v792_v52, %v1209_v60  ;;  %v809_v5 = vmax.f32 %v793_v53, %v1210_v63  ;;  %s826_s8 = sshll.u32 %s1240_s7, 4  ;;  %s827_s8 = int_to_ptr.vmem [resolvable:$true] %s826_s8 }
  0x84   :  { %v810_v6 = vmax.f32 %v794_v54, %v1211_v0  ;;  %v811_v7 = vmax.f32 %v795_v57, %v1212_v1  ;;  %813 = vst.msk [vmem:[#allocation2] sm:$0xf] %vm812_vm0, %v804_v61  ;;  %814 = vst.msk [vmem:[#allocation2 + $0x4] sm:$0xf] %vm812_vm0, %v805_v62  ;;  %s1216_s9 = scalar_lea.vmem %s827_s8, 512  ;;  %p1221_p1 = scmp.lt.s32.totalorder %s827_s8, %s827_s8 }
  0x85   :  { %815 = vst.msk [vmem:[#allocation2 + $0x8] sm:$0xf] %vm812_vm0, %v806_v2  ;;  %816 = vst.msk [vmem:[#allocation2 + $0xc] sm:$0xf] %vm812_vm0, %v807_v3  ;;  %p1217_p0 = scmp.ne.s32.totalorder %s827_s8, %s1216_s9  ;;  %p1222_p2 = scmp.lt.s32.totalorder %s1216_s9, %s1216_s9 }
  0x86   :  { %817 = vst.msk [vmem:[#allocation2 + $0x10] sm:$0xf] %vm812_vm0, %v808_v4  ;;  %818 = vst.msk [vmem:[#allocation2 + $0x14] sm:$0xf] %vm812_vm0, %v809_v5 }
  0x87   :  { %819 = vst.msk [vmem:[#allocation2 + $0x18] sm:$0xf] %vm812_vm0, %v810_v6  ;;  %820 = vst.msk [vmem:[#allocation2 + $0x1c] sm:$0xf] %vm812_vm0, %v811_v7  ;;  %p1223_p3 = por %p1222_p2, %p1221_p1 }
  0x89   :  { %p1224_p4 = pnand %p1223_p3, %p1217_p0 }
  0x8b   :  { %1227 = shalt.err (!%p1224_p4)
}
  0x8c   :  { %s1228_s11 = scalar_lea.hbm %s2442_s1, 512 }
  0x8d   :  { %p1229_p5 = scmp.ne.s32.totalorder %s2442_s1, %s1228_s11  ;;  %p1232_p6 = scmp.lt.u32.totalorder %s1228_s11, %s2442_s1 }
  0x8f   :  { %p1234_p7 = pnand %p1232_p6, %p1229_p5 }
  0x91   :  { %1237 = shalt.err (!%p1234_p7)
}
  0x92   :  { %s1241_s16 = smov 64   ;;  %s1242_s17 = smov 4  }
  0x93   :  { %832 = dma.vmem_to_hbm [thread:$0]  %s827_s8, 512, %s2442_s1, [#allocation3], %s1241_s16, %s1241_s16, %s1242_s17  }
  0x94   :  { %1238 = dma.done.wait [#allocation3], 512  }
  0x95   :  { %1239 = vsyncadd [#allocation3], 4294966784 }
  0x96   :  { %836 = vsyncpa [#allocation3], 1 }

</bundles_post_ra>
